<compile_context>
chip_gen: v7x
topology: tpu7x:2x2x1
jax: 0.10.0
libtpu: 0.0.40
codegen_flags: <defaults>
</compile_context>

<pallas_src>
import functools

import jax
import jax.numpy as jnp
from jax import lax
from jax.experimental import pallas as pl
from jax.experimental.pallas import tpu as pltpu


def _micro_controller_kernel(
    cfg_ref,         # VMEM (L, 1) int32  : ctx_config (column)
    lcfg_ref,        # VMEM (L, 1) int32  : left_config (column)
    gates0_ref,      # VMEM (1, 4H) f32   : g_emb @ W_ih^T + b  (step-0 gates)
    w_comb_ref,      # VMEM (H, 4H) bf16  : (W_ih + W_hh)^T
    b_ref,           # VMEM (1, 4H) f32   : b_ih + b_hh
    ctx_w_ref,       # VMEM (L, 2H, OP) bf16
    ctx_b_ref,       # VMEM (L, OP) f32
    left_w_ref,      # VMEM (L, 2H, GAP) bf16
    left_b_ref,      # VMEM (L, GAP) f32
    ent_ref,         # SMEM (1,) f32 out  : total entropy
    lp_ref,          # SMEM (1,) f32 out  : total log_prob
    feat_ref,        # VMEM scratch (L, 2H) f32 : [fwd_i | bwd_{L-1-i}]
    fill_feat_ref,   # VMEM scratch (L, 2H) f32 : fill-step features
    *,
    action_len: int,
    hidden_size: int,
    fill: int,
):
    H = hidden_size
    L = action_len

    w_comb = w_comb_ref[...]
    b = b_ref[...]

    def gates_from_h(h):
        # x == h on every step after the first -> single fused dot (bf16 MXU).
        return (jnp.dot(h.astype(jnp.bfloat16), w_comb,
                        preferred_element_type=jnp.float32) + b)

    def apply_gates(gates, c):
        # One full-vreg sigmoid + one full-vreg tanh (gate order: i, f, g, o).
        sig = jax.nn.sigmoid(gates)
        tg = jnp.tanh(gates)
        i_g = sig[:, 0:H]
        f_g = sig[:, H:2 * H]
        g_g = tg[:, 2 * H:3 * H]
        o_g = sig[:, 3 * H:4 * H]
        c_new = f_g * c + i_g * g_g
        h_new = o_g * jnp.tanh(c_new)
        return h_new, c_new

    # ---------------- rollout (states go straight into VMEM scratch) --------
    c0 = jnp.zeros((1, H), jnp.float32)
    h, c = apply_gates(gates0_ref[...], c0)           # step 0: h_prev == 0
    feat_ref[pl.ds(0, 1), pl.ds(0, H)] = h
    if fill:
        h, c = apply_gates(gates_from_h(h), c)
        fill_feat_ref[pl.ds(0, 1), pl.ds(0, H)] = h
    for i in range(1, L):
        h, c = apply_gates(gates_from_h(h), c)
        feat_ref[pl.ds(i, 1), pl.ds(0, H)] = h
        if fill:
            h, c = apply_gates(gates_from_h(h), c)
            fill_feat_ref[pl.ds(i, 1), pl.ds(0, H)] = h
    # "backward" half of the rollout (same single LSTMCell, continued).
    for j in range(L):
        h, c = apply_gates(gates_from_h(h), c)
        feat_ref[pl.ds(L - 1 - j, 1), pl.ds(H, H)] = h
        if fill:
            h, c = apply_gates(gates_from_h(h), c)
            fill_feat_ref[pl.ds(L - 1 - j, 1), pl.ds(H, H)] = h

    # ---------------- batched critic ----------------------------------------
    def batched_critic(logits, pos_col):
        # Row-wise softmax / log-softmax, entropy, and one-hot log-prob gather.
        m = jnp.max(logits, axis=-1, keepdims=True)
        z = logits - m
        e = jnp.exp(z)
        denom = jnp.sum(e, axis=-1, keepdims=True)
        p = e * pl.reciprocal(denom, approx=True)
        logp = z - jnp.log(denom)
        ent_rows = -jnp.sum(p * logp, axis=-1, keepdims=True)            # (L,1)
        onehot = lax.broadcasted_iota(jnp.int32, logits.shape, 1) == pos_col
        lp_rows = jnp.sum(jnp.where(onehot, logp, jnp.float32(0.0)),
                          axis=-1, keepdims=True)                        # (L,1)
        return ent_rows, lp_rows

    cfg = cfg_ref[...]                                 # (L, 1) int32
    feat = feat_ref[...].astype(jnp.bfloat16)          # (L, 2H)
    ctx_rows = [
        jnp.dot(feat[i:i + 1, :], ctx_w_ref[i],
                preferred_element_type=jnp.float32)
        for i in range(L)
    ]
    ctx_logits = jnp.concatenate(ctx_rows, axis=0) + ctx_b_ref[...]      # (L,OP)
    ctx_ent, ctx_lp = batched_critic(ctx_logits, cfg)
    entropy = jnp.sum(ctx_ent)
    log_prob = jnp.sum(ctx_lp)

    if fill:
        lcfg = lcfg_ref[...]
        fill_feat = fill_feat_ref[...].astype(jnp.bfloat16)
        left_rows = [
            jnp.dot(fill_feat[i:i + 1, :], left_w_ref[i],
                    preferred_element_type=jnp.float32)
            for i in range(L)
        ]
        left_logits = jnp.concatenate(left_rows, axis=0) + left_b_ref[...]
        left_ent, left_lp = batched_critic(left_logits, lcfg)
        take = cfg == 1                    # left branch counted only if pos==1
        entropy = entropy + jnp.sum(jnp.where(take, left_ent, jnp.float32(0.0)))
        log_prob = log_prob + jnp.sum(jnp.where(take, left_lp, jnp.float32(0.0)))

    ent_ref[0] = entropy
    lp_ref[0] = log_prob


def micro_controller_evaluate(
    config, left_config, g_emb, w_ih_t, w_hh_t, b,
    ctx_w_t, ctx_b, left_w_t, left_b,
    *, action_len, hidden_size, fill,
):
    L, H = action_len, hidden_size

    # Host-side pre-transforms (plain XLA ops, outside the kernel).
    b2 = b.reshape(1, 4 * H).astype(jnp.float32)
    gates0 = g_emb.astype(jnp.float32) @ w_ih_t.astype(jnp.float32) + b2
    w_comb = (w_ih_t + w_hh_t).astype(jnp.bfloat16)            # x == h fusion
    ctx_w_bf = ctx_w_t.astype(jnp.bfloat16)
    left_w_bf = left_w_t.astype(jnp.bfloat16)
    cfg = config.astype(jnp.int32).reshape(L, 1)
    lcfg = left_config.astype(jnp.int32).reshape(L, 1)

    kernel = functools.partial(
        _micro_controller_kernel,
        action_len=L, hidden_size=H, fill=fill,
    )
    vmem = pl.BlockSpec(memory_space=pltpu.MemorySpace.VMEM)
    smem = pl.BlockSpec(memory_space=pltpu.MemorySpace.SMEM)
    ent, lp = pl.pallas_call(
        kernel,
        out_shape=(
            jax.ShapeDtypeStruct((1,), jnp.float32),
            jax.ShapeDtypeStruct((1,), jnp.float32),
        ),
        in_specs=[vmem] * 9,
        out_specs=(smem, smem),
        scratch_shapes=[
            pltpu.VMEM((L, 2 * H), jnp.float32),   # [fwd | bwd] features
            pltpu.VMEM((L, 2 * H), jnp.float32),   # fill-step features
        ],
    )(cfg, lcfg, gates0, w_comb, b2,
      ctx_w_bf, ctx_b, left_w_bf, left_b)
    return ent[0], lp[0]


def reference_evaluate(
    config, left_config, g_emb, w_ih_t, w_hh_t, b,
    ctx_w_t, ctx_b, left_w_t, left_b,
    *, action_len, hidden_size, fill,
):
    """Pure-JAX f32 reference mirroring the PyTorch forward (evaluate path)."""
    H, L = hidden_size, action_len

    def lstm_step(x, h, c):
        gates = x @ w_ih_t + h @ w_hh_t + b
        i_g = jax.nn.sigmoid(gates[:, 0:H])
        f_g = jax.nn.sigmoid(gates[:, H:2 * H])
        g_g = jnp.tanh(gates[:, 2 * H:3 * H])
        o_g = jax.nn.sigmoid(gates[:, 3 * H:4 * H])
        c_new = f_g * c + i_g * g_g
        return o_g * jnp.tanh(c_new), c_new

    inputs = g_emb
    h = jnp.zeros((1, H), jnp.float32)
    c = jnp.zeros((1, H), jnp.float32)
    fo, ffo, bo, bfo = [], [], [], []
    for _ in range(L):
        h, c = lstm_step(inputs, h, c); fo.append(h); inputs = h
        if fill:
            h, c = lstm_step(inputs, h, c); ffo.append(h); inputs = h
    for _ in range(L):
        h, c = lstm_step(inputs, h, c); bo.append(h); inputs = h
        if fill:
            h, c = lstm_step(inputs, h, c); bfo.append(h); inputs = h

    def critic(logits, pos):
        p = jax.nn.softmax(logits, axis=-1)
        logp = jax.nn.log_softmax(logits, axis=-1)
        ent = -jnp.sum(p * logp)
        return ent, logp[0, pos]

    entropy = jnp.float32(0.0)
    log_prob = jnp.float32(0.0)
    for i in range(L):
        pos = int(config[i])
        logits = jnp.concatenate([fo[i], bo[L - 1 - i]], axis=1) @ ctx_w_t[i] + ctx_b[i]
        e, lp_ = critic(logits, pos)
        entropy += e
        log_prob += lp_
        if fill and pos == 1:
            l_pos = int(left_config[i])
            l_logits = (jnp.concatenate([ffo[i], bfo[L - 1 - i]], axis=1)
                        @ left_w_t[i] + left_b[i])
            e, lp_ = critic(l_logits, l_pos)
            entropy += e
            log_prob += lp_
    return entropy, log_prob


if __name__ == "__main__":
    op_size = 10
    hidden_size = 32
    action_len = 4
    fill = 1
    dyn_gap_count = 6

    key = jax.random.PRNGKey(0)
    keys = jax.random.split(key, 9)
    init = lambda k, shape: jax.random.uniform(
        k, shape, jnp.float32, minval=-0.1, maxval=0.1
    )

    # Parameters (same shapes as the PyTorch module, init uniform(-0.1, 0.1)).
    g_emb = init(keys[0], (1, hidden_size))
    w_ih = init(keys[1], (4 * hidden_size, hidden_size))       # LSTMCell weight_ih
    w_hh = init(keys[2], (4 * hidden_size, hidden_size))       # LSTMCell weight_hh
    b_ih = init(keys[3], (4 * hidden_size,))
    b_hh = init(keys[4], (4 * hidden_size,))
    ctx_w = init(keys[5], (action_len, op_size, 2 * hidden_size))        # ctx_fcs
    ctx_b = init(keys[6], (action_len, op_size))
    left_w = init(keys[7], (action_len, dyn_gap_count, 2 * hidden_size))  # left_fcs
    left_b = init(keys[8], (action_len, dyn_gap_count))

    # Pre-transpose / pre-sum for lane-major kernel layout.
    w_ih_t = jnp.asarray(w_ih.T)                       # (H, 4H)
    w_hh_t = jnp.asarray(w_hh.T)                       # (H, 4H)
    b = (b_ih + b_hh)[None, :]                         # (1, 4H)
    ctx_w_t = jnp.transpose(ctx_w, (0, 2, 1))          # (L, 2H, OP)
    left_w_t = jnp.transpose(left_w, (0, 2, 1))        # (L, 2H, GAP)

    # Architecture config being evaluated (ctx choices and "left" choices).
    config = jnp.array([1, 0, 2, 1], dtype=jnp.int32)
    left_config = jnp.array([2, 0, 3, 1], dtype=jnp.int32)

    ent, lp = micro_controller_evaluate(
        config, left_config, g_emb, w_ih_t, w_hh_t, b,
        ctx_w_t, ctx_b, left_w_t, left_b,
        action_len=action_len, hidden_size=hidden_size, fill=fill,
    )
    jax.block_until_ready((ent, lp))

    ref_ent, ref_lp = reference_evaluate(
        config, left_config, g_emb, w_ih_t, w_hh_t, b,
        ctx_w_t, ctx_b, left_w_t, left_b,
        action_len=action_len, hidden_size=hidden_size, fill=fill,
    )

    assert jnp.allclose(ent, ref_ent, rtol=2e-2, atol=5e-2), (ent, ref_ent)
    assert jnp.allclose(lp, ref_lp, rtol=2e-2, atol=5e-2), (lp, ref_lp)
    print("KERNEL_OK")
</pallas_src>

<mosaic_0001>
module attributes {stable_mosaic.version = 11 : i64} {
  func.func @_micro_controller_kernel(%arg0: memref<4x1xi32, #tpu.memory_space<vmem>>, %arg1: memref<4x1xi32, #tpu.memory_space<vmem>>, %arg2: memref<1x128xf32, #tpu.memory_space<vmem>>, %arg3: memref<32x128xbf16, #tpu.memory_space<vmem>>, %arg4: memref<1x128xf32, #tpu.memory_space<vmem>>, %arg5: memref<4x64x10xbf16, #tpu.memory_space<vmem>>, %arg6: memref<4x10xf32, #tpu.memory_space<vmem>>, %arg7: memref<4x64x6xbf16, #tpu.memory_space<vmem>>, %arg8: memref<4x6xf32, #tpu.memory_space<vmem>>, %arg9: memref<1xf32, #tpu.memory_space<smem>>, %arg10: memref<1xf32, #tpu.memory_space<smem>>, %arg11: memref<4x64xf32, #tpu.memory_space<vmem>>, %arg12: memref<4x64xf32, #tpu.memory_space<vmem>>) attributes {dimension_semantics = [], scalar_prefetch = 0 : i64, scratch_operands = 2 : i64, tpu.core_type = #tpu.core_type<tc>} {
    %c0 = arith.constant 0 : index
    %c0_0 = arith.constant 0 : index
    %0 = vector.load %arg3[%c0, %c0_0] : memref<32x128xbf16, #tpu.memory_space<vmem>>, vector<32x128xbf16>
    %c0_1 = arith.constant 0 : index
    %c0_2 = arith.constant 0 : index
    %1 = vector.load %arg4[%c0_1, %c0_2] : memref<1x128xf32, #tpu.memory_space<vmem>>, vector<1x128xf32>
    %cst = arith.constant 0.000000e+00 : f32
    %2 = vector.broadcast %cst : f32 to vector<1x32xf32>
    %c0_3 = arith.constant 0 : index
    %c0_4 = arith.constant 0 : index
    %3 = vector.load %arg2[%c0_3, %c0_4] : memref<1x128xf32, #tpu.memory_space<vmem>>, vector<1x128xf32>
    %4 = arith.negf %3 : vector<1x128xf32>
    %5 = math.exp %4 : vector<1x128xf32>
    %cst_5 = arith.constant 1.000000e+00 : f32
    %6 = vector.broadcast %cst_5 : f32 to vector<1x128xf32>
    %7 = arith.addf %6, %5 : vector<1x128xf32>
    %8 = arith.divf %6, %7 : vector<1x128xf32>
    %9 = math.tanh %3 : vector<1x128xf32>
    %10 = vector.extract_strided_slice %8 {offsets = [0, 0], sizes = [1, 32], strides = [1, 1]} : vector<1x128xf32> to vector<1x32xf32>
    %11 = vector.extract_strided_slice %8 {offsets = [0, 32], sizes = [1, 32], strides = [1, 1]} : vector<1x128xf32> to vector<1x32xf32>
    %12 = vector.extract_strided_slice %9 {offsets = [0, 64], sizes = [1, 32], strides = [1, 1]} : vector<1x128xf32> to vector<1x32xf32>
    %13 = vector.extract_strided_slice %8 {offsets = [0, 96], sizes = [1, 32], strides = [1, 1]} : vector<1x128xf32> to vector<1x32xf32>
    %14 = arith.mulf %11, %2 : vector<1x32xf32>
    %15 = arith.mulf %10, %12 : vector<1x32xf32>
    %16 = arith.addf %14, %15 : vector<1x32xf32>
    %17 = math.tanh %16 : vector<1x32xf32>
    %18 = arith.mulf %13, %17 : vector<1x32xf32>
    %c0_6 = arith.constant 0 : index
    %c0_7 = arith.constant 0 : index
    %19 = vector.load %arg11[%c0_6, %c0_7] : memref<4x64xf32, #tpu.memory_space<vmem>>, vector<1x32xf32>
    tpu.vector_store %arg11[%c0_6, %c0_7], %18 {strides = array<i32>} : memref<4x64xf32, #tpu.memory_space<vmem>>, vector<1x32xf32>,
    %20 = arith.truncf %18 : vector<1x32xf32> to vector<1x32xbf16>
    %cst_8 = arith.constant dense<0.000000e+00> : vector<1x128xf32>
    %21 = tpu.matmul %20, %0, %cst_8 {dimension_numbers = #tpu.dot_dimension_numbers<[1], [0], [0], [1], [0, 0, 1, 1], [], []>} : vector<1x32xbf16>, vector<32x128xbf16>, vector<1x128xf32> -> vector<1x128xf32>
    %22 = arith.addf %21, %1 : vector<1x128xf32>
    %23 = arith.negf %22 : vector<1x128xf32>
    %24 = math.exp %23 : vector<1x128xf32>
    %cst_9 = arith.constant 1.000000e+00 : f32
    %25 = vector.broadcast %cst_9 : f32 to vector<1x128xf32>
    %26 = arith.addf %25, %24 : vector<1x128xf32>
    %27 = arith.divf %25, %26 : vector<1x128xf32>
    %28 = math.tanh %22 : vector<1x128xf32>
    %29 = vector.extract_strided_slice %27 {offsets = [0, 0], sizes = [1, 32], strides = [1, 1]} : vector<1x128xf32> to vector<1x32xf32>
    %30 = vector.extract_strided_slice %27 {offsets = [0, 32], sizes = [1, 32], strides = [1, 1]} : vector<1x128xf32> to vector<1x32xf32>
    %31 = vector.extract_strided_slice %28 {offsets = [0, 64], sizes = [1, 32], strides = [1, 1]} : vector<1x128xf32> to vector<1x32xf32>
    %32 = vector.extract_strided_slice %27 {offsets = [0, 96], sizes = [1, 32], strides = [1, 1]} : vector<1x128xf32> to vector<1x32xf32>
    %33 = arith.mulf %30, %16 : vector<1x32xf32>
    %34 = arith.mulf %29, %31 : vector<1x32xf32>
    %35 = arith.addf %33, %34 : vector<1x32xf32>
    %36 = math.tanh %35 : vector<1x32xf32>
    %37 = arith.mulf %32, %36 : vector<1x32xf32>
    %c0_10 = arith.constant 0 : index
    %c0_11 = arith.constant 0 : index
    %38 = vector.load %arg12[%c0_10, %c0_11] : memref<4x64xf32, #tpu.memory_space<vmem>>, vector<1x32xf32>
    tpu.vector_store %arg12[%c0_10, %c0_11], %37 {strides = array<i32>} : memref<4x64xf32, #tpu.memory_space<vmem>>, vector<1x32xf32>,
    %39 = arith.truncf %37 : vector<1x32xf32> to vector<1x32xbf16>
    %cst_12 = arith.constant dense<0.000000e+00> : vector<1x128xf32>
    %40 = tpu.matmul %39, %0, %cst_12 {dimension_numbers = #tpu.dot_dimension_numbers<[1], [0], [0], [1], [0, 0, 1, 1], [], []>} : vector<1x32xbf16>, vector<32x128xbf16>, vector<1x128xf32> -> vector<1x128xf32>
    %41 = arith.addf %40, %1 : vector<1x128xf32>
    %42 = arith.negf %41 : vector<1x128xf32>
    %43 = math.exp %42 : vector<1x128xf32>
    %cst_13 = arith.constant 1.000000e+00 : f32
    %44 = vector.broadcast %cst_13 : f32 to vector<1x128xf32>
    %45 = arith.addf %44, %43 : vector<1x128xf32>
    %46 = arith.divf %44, %45 : vector<1x128xf32>
    %47 = math.tanh %41 : vector<1x128xf32>
    %48 = vector.extract_strided_slice %46 {offsets = [0, 0], sizes = [1, 32], strides = [1, 1]} : vector<1x128xf32> to vector<1x32xf32>
    %49 = vector.extract_strided_slice %46 {offsets = [0, 32], sizes = [1, 32], strides = [1, 1]} : vector<1x128xf32> to vector<1x32xf32>
    %50 = vector.extract_strided_slice %47 {offsets = [0, 64], sizes = [1, 32], strides = [1, 1]} : vector<1x128xf32> to vector<1x32xf32>
    %51 = vector.extract_strided_slice %46 {offsets = [0, 96], sizes = [1, 32], strides = [1, 1]} : vector<1x128xf32> to vector<1x32xf32>
    %52 = arith.mulf %49, %35 : vector<1x32xf32>
    %53 = arith.mulf %48, %50 : vector<1x32xf32>
    %54 = arith.addf %52, %53 : vector<1x32xf32>
    %55 = math.tanh %54 : vector<1x32xf32>
    %56 = arith.mulf %51, %55 : vector<1x32xf32>
    %c1 = arith.constant 1 : index
    %c0_14 = arith.constant 0 : index
    %57 = vector.load %arg11[%c1, %c0_14] : memref<4x64xf32, #tpu.memory_space<vmem>>, vector<1x32xf32>
    tpu.vector_store %arg11[%c1, %c0_14], %56 {strides = array<i32>} : memref<4x64xf32, #tpu.memory_space<vmem>>, vector<1x32xf32>,
    %58 = arith.truncf %56 : vector<1x32xf32> to vector<1x32xbf16>
    %cst_15 = arith.constant dense<0.000000e+00> : vector<1x128xf32>
    %59 = tpu.matmul %58, %0, %cst_15 {dimension_numbers = #tpu.dot_dimension_numbers<[1], [0], [0], [1], [0, 0, 1, 1], [], []>} : vector<1x32xbf16>, vector<32x128xbf16>, vector<1x128xf32> -> vector<1x128xf32>
    %60 = arith.addf %59, %1 : vector<1x128xf32>
    %61 = arith.negf %60 : vector<1x128xf32>
    %62 = math.exp %61 : vector<1x128xf32>
    %cst_16 = arith.constant 1.000000e+00 : f32
    %63 = vector.broadcast %cst_16 : f32 to vector<1x128xf32>
    %64 = arith.addf %63, %62 : vector<1x128xf32>
    %65 = arith.divf %63, %64 : vector<1x128xf32>
    %66 = math.tanh %60 : vector<1x128xf32>
    %67 = vector.extract_strided_slice %65 {offsets = [0, 0], sizes = [1, 32], strides = [1, 1]} : vector<1x128xf32> to vector<1x32xf32>
    %68 = vector.extract_strided_slice %65 {offsets = [0, 32], sizes = [1, 32], strides = [1, 1]} : vector<1x128xf32> to vector<1x32xf32>
    %69 = vector.extract_strided_slice %66 {offsets = [0, 64], sizes = [1, 32], strides = [1, 1]} : vector<1x128xf32> to vector<1x32xf32>
    %70 = vector.extract_strided_slice %65 {offsets = [0, 96], sizes = [1, 32], strides = [1, 1]} : vector<1x128xf32> to vector<1x32xf32>
    %71 = arith.mulf %68, %54 : vector<1x32xf32>
    %72 = arith.mulf %67, %69 : vector<1x32xf32>
    %73 = arith.addf %71, %72 : vector<1x32xf32>
    %74 = math.tanh %73 : vector<1x32xf32>
    %75 = arith.mulf %70, %74 : vector<1x32xf32>
    %c1_17 = arith.constant 1 : index
    %c0_18 = arith.constant 0 : index
    %76 = vector.load %arg12[%c1_17, %c0_18] : memref<4x64xf32, #tpu.memory_space<vmem>>, vector<1x32xf32>
    tpu.vector_store %arg12[%c1_17, %c0_18], %75 {strides = array<i32>} : memref<4x64xf32, #tpu.memory_space<vmem>>, vector<1x32xf32>,
    %77 = arith.truncf %75 : vector<1x32xf32> to vector<1x32xbf16>
    %cst_19 = arith.constant dense<0.000000e+00> : vector<1x128xf32>
    %78 = tpu.matmul %77, %0, %cst_19 {dimension_numbers = #tpu.dot_dimension_numbers<[1], [0], [0], [1], [0, 0, 1, 1], [], []>} : vector<1x32xbf16>, vector<32x128xbf16>, vector<1x128xf32> -> vector<1x128xf32>
    %79 = arith.addf %78, %1 : vector<1x128xf32>
    %80 = arith.negf %79 : vector<1x128xf32>
    %81 = math.exp %80 : vector<1x128xf32>
    %cst_20 = arith.constant 1.000000e+00 : f32
    %82 = vector.broadcast %cst_20 : f32 to vector<1x128xf32>
    %83 = arith.addf %82, %81 : vector<1x128xf32>
    %84 = arith.divf %82, %83 : vector<1x128xf32>
    %85 = math.tanh %79 : vector<1x128xf32>
    %86 = vector.extract_strided_slice %84 {offsets = [0, 0], sizes = [1, 32], strides = [1, 1]} : vector<1x128xf32> to vector<1x32xf32>
    %87 = vector.extract_strided_slice %84 {offsets = [0, 32], sizes = [1, 32], strides = [1, 1]} : vector<1x128xf32> to vector<1x32xf32>
    %88 = vector.extract_strided_slice %85 {offsets = [0, 64], sizes = [1, 32], strides = [1, 1]} : vector<1x128xf32> to vector<1x32xf32>
    %89 = vector.extract_strided_slice %84 {offsets = [0, 96], sizes = [1, 32], strides = [1, 1]} : vector<1x128xf32> to vector<1x32xf32>
    %90 = arith.mulf %87, %73 : vector<1x32xf32>
    %91 = arith.mulf %86, %88 : vector<1x32xf32>
    %92 = arith.addf %90, %91 : vector<1x32xf32>
    %93 = math.tanh %92 : vector<1x32xf32>
    %94 = arith.mulf %89, %93 : vector<1x32xf32>
    %c2 = arith.constant 2 : index
    %c0_21 = arith.constant 0 : index
    %95 = vector.load %arg11[%c2, %c0_21] : memref<4x64xf32, #tpu.memory_space<vmem>>, vector<1x32xf32>
    tpu.vector_store %arg11[%c2, %c0_21], %94 {strides = array<i32>} : memref<4x64xf32, #tpu.memory_space<vmem>>, vector<1x32xf32>,
    %96 = arith.truncf %94 : vector<1x32xf32> to vector<1x32xbf16>
    %cst_22 = arith.constant dense<0.000000e+00> : vector<1x128xf32>
    %97 = tpu.matmul %96, %0, %cst_22 {dimension_numbers = #tpu.dot_dimension_numbers<[1], [0], [0], [1], [0, 0, 1, 1], [], []>} : vector<1x32xbf16>, vector<32x128xbf16>, vector<1x128xf32> -> vector<1x128xf32>
    %98 = arith.addf %97, %1 : vector<1x128xf32>
    %99 = arith.negf %98 : vector<1x128xf32>
    %100 = math.exp %99 : vector<1x128xf32>
    %cst_23 = arith.constant 1.000000e+00 : f32
    %101 = vector.broadcast %cst_23 : f32 to vector<1x128xf32>
    %102 = arith.addf %101, %100 : vector<1x128xf32>
    %103 = arith.divf %101, %102 : vector<1x128xf32>
    %104 = math.tanh %98 : vector<1x128xf32>
    %105 = vector.extract_strided_slice %103 {offsets = [0, 0], sizes = [1, 32], strides = [1, 1]} : vector<1x128xf32> to vector<1x32xf32>
    %106 = vector.extract_strided_slice %103 {offsets = [0, 32], sizes = [1, 32], strides = [1, 1]} : vector<1x128xf32> to vector<1x32xf32>
    %107 = vector.extract_strided_slice %104 {offsets = [0, 64], sizes = [1, 32], strides = [1, 1]} : vector<1x128xf32> to vector<1x32xf32>
    %108 = vector.extract_strided_slice %103 {offsets = [0, 96], sizes = [1, 32], strides = [1, 1]} : vector<1x128xf32> to vector<1x32xf32>
    %109 = arith.mulf %106, %92 : vector<1x32xf32>
    %110 = arith.mulf %105, %107 : vector<1x32xf32>
    %111 = arith.addf %109, %110 : vector<1x32xf32>
    %112 = math.tanh %111 : vector<1x32xf32>
    %113 = arith.mulf %108, %112 : vector<1x32xf32>
    %c2_24 = arith.constant 2 : index
    %c0_25 = arith.constant 0 : index
    %114 = vector.load %arg12[%c2_24, %c0_25] : memref<4x64xf32, #tpu.memory_space<vmem>>, vector<1x32xf32>
    tpu.vector_store %arg12[%c2_24, %c0_25], %113 {strides = array<i32>} : memref<4x64xf32, #tpu.memory_space<vmem>>, vector<1x32xf32>,
    %115 = arith.truncf %113 : vector<1x32xf32> to vector<1x32xbf16>
    %cst_26 = arith.constant dense<0.000000e+00> : vector<1x128xf32>
    %116 = tpu.matmul %115, %0, %cst_26 {dimension_numbers = #tpu.dot_dimension_numbers<[1], [0], [0], [1], [0, 0, 1, 1], [], []>} : vector<1x32xbf16>, vector<32x128xbf16>, vector<1x128xf32> -> vector<1x128xf32>
    %117 = arith.addf %116, %1 : vector<1x128xf32>
    %118 = arith.negf %117 : vector<1x128xf32>
    %119 = math.exp %118 : vector<1x128xf32>
    %cst_27 = arith.constant 1.000000e+00 : f32
    %120 = vector.broadcast %cst_27 : f32 to vector<1x128xf32>
    %121 = arith.addf %120, %119 : vector<1x128xf32>
    %122 = arith.divf %120, %121 : vector<1x128xf32>
    %123 = math.tanh %117 : vector<1x128xf32>
    %124 = vector.extract_strided_slice %122 {offsets = [0, 0], sizes = [1, 32], strides = [1, 1]} : vector<1x128xf32> to vector<1x32xf32>
    %125 = vector.extract_strided_slice %122 {offsets = [0, 32], sizes = [1, 32], strides = [1, 1]} : vector<1x128xf32> to vector<1x32xf32>
    %126 = vector.extract_strided_slice %123 {offsets = [0, 64], sizes = [1, 32], strides = [1, 1]} : vector<1x128xf32> to vector<1x32xf32>
    %127 = vector.extract_strided_slice %122 {offsets = [0, 96], sizes = [1, 32], strides = [1, 1]} : vector<1x128xf32> to vector<1x32xf32>
    %128 = arith.mulf %125, %111 : vector<1x32xf32>
    %129 = arith.mulf %124, %126 : vector<1x32xf32>
    %130 = arith.addf %128, %129 : vector<1x32xf32>
    %131 = math.tanh %130 : vector<1x32xf32>
    %132 = arith.mulf %127, %131 : vector<1x32xf32>
    %c3 = arith.constant 3 : index
    %c0_28 = arith.constant 0 : index
    %133 = vector.load %arg11[%c3, %c0_28] : memref<4x64xf32, #tpu.memory_space<vmem>>, vector<1x32xf32>
    tpu.vector_store %arg11[%c3, %c0_28], %132 {strides = array<i32>} : memref<4x64xf32, #tpu.memory_space<vmem>>, vector<1x32xf32>,
    %134 = arith.truncf %132 : vector<1x32xf32> to vector<1x32xbf16>
    %cst_29 = arith.constant dense<0.000000e+00> : vector<1x128xf32>
    %135 = tpu.matmul %134, %0, %cst_29 {dimension_numbers = #tpu.dot_dimension_numbers<[1], [0], [0], [1], [0, 0, 1, 1], [], []>} : vector<1x32xbf16>, vector<32x128xbf16>, vector<1x128xf32> -> vector<1x128xf32>
    %136 = arith.addf %135, %1 : vector<1x128xf32>
    %137 = arith.negf %136 : vector<1x128xf32>
    %138 = math.exp %137 : vector<1x128xf32>
    %cst_30 = arith.constant 1.000000e+00 : f32
    %139 = vector.broadcast %cst_30 : f32 to vector<1x128xf32>
    %140 = arith.addf %139, %138 : vector<1x128xf32>
    %141 = arith.divf %139, %140 : vector<1x128xf32>
    %142 = math.tanh %136 : vector<1x128xf32>
    %143 = vector.extract_strided_slice %141 {offsets = [0, 0], sizes = [1, 32], strides = [1, 1]} : vector<1x128xf32> to vector<1x32xf32>
    %144 = vector.extract_strided_slice %141 {offsets = [0, 32], sizes = [1, 32], strides = [1, 1]} : vector<1x128xf32> to vector<1x32xf32>
    %145 = vector.extract_strided_slice %142 {offsets = [0, 64], sizes = [1, 32], strides = [1, 1]} : vector<1x128xf32> to vector<1x32xf32>
    %146 = vector.extract_strided_slice %141 {offsets = [0, 96], sizes = [1, 32], strides = [1, 1]} : vector<1x128xf32> to vector<1x32xf32>
    %147 = arith.mulf %144, %130 : vector<1x32xf32>
    %148 = arith.mulf %143, %145 : vector<1x32xf32>
    %149 = arith.addf %147, %148 : vector<1x32xf32>
    %150 = math.tanh %149 : vector<1x32xf32>
    %151 = arith.mulf %146, %150 : vector<1x32xf32>
    %c3_31 = arith.constant 3 : index
    %c0_32 = arith.constant 0 : index
    %152 = vector.load %arg12[%c3_31, %c0_32] : memref<4x64xf32, #tpu.memory_space<vmem>>, vector<1x32xf32>
    tpu.vector_store %arg12[%c3_31, %c0_32], %151 {strides = array<i32>} : memref<4x64xf32, #tpu.memory_space<vmem>>, vector<1x32xf32>,
    %153 = arith.truncf %151 : vector<1x32xf32> to vector<1x32xbf16>
    %cst_33 = arith.constant dense<0.000000e+00> : vector<1x128xf32>
    %154 = tpu.matmul %153, %0, %cst_33 {dimension_numbers = #tpu.dot_dimension_numbers<[1], [0], [0], [1], [0, 0, 1, 1], [], []>} : vector<1x32xbf16>, vector<32x128xbf16>, vector<1x128xf32> -> vector<1x128xf32>
    %155 = arith.addf %154, %1 : vector<1x128xf32>
    %156 = arith.negf %155 : vector<1x128xf32>
    %157 = math.exp %156 : vector<1x128xf32>
    %cst_34 = arith.constant 1.000000e+00 : f32
    %158 = vector.broadcast %cst_34 : f32 to vector<1x128xf32>
    %159 = arith.addf %158, %157 : vector<1x128xf32>
    %160 = arith.divf %158, %159 : vector<1x128xf32>
    %161 = math.tanh %155 : vector<1x128xf32>
    %162 = vector.extract_strided_slice %160 {offsets = [0, 0], sizes = [1, 32], strides = [1, 1]} : vector<1x128xf32> to vector<1x32xf32>
    %163 = vector.extract_strided_slice %160 {offsets = [0, 32], sizes = [1, 32], strides = [1, 1]} : vector<1x128xf32> to vector<1x32xf32>
    %164 = vector.extract_strided_slice %161 {offsets = [0, 64], sizes = [1, 32], strides = [1, 1]} : vector<1x128xf32> to vector<1x32xf32>
    %165 = vector.extract_strided_slice %160 {offsets = [0, 96], sizes = [1, 32], strides = [1, 1]} : vector<1x128xf32> to vector<1x32xf32>
    %166 = arith.mulf %163, %149 : vector<1x32xf32>
    %167 = arith.mulf %162, %164 : vector<1x32xf32>
    %168 = arith.addf %166, %167 : vector<1x32xf32>
    %169 = math.tanh %168 : vector<1x32xf32>
    %170 = arith.mulf %165, %169 : vector<1x32xf32>
    %c3_35 = arith.constant 3 : index
    %c32 = arith.constant 32 : index
    %171 = vector.load %arg11[%c3_35, %c32] : memref<4x64xf32, #tpu.memory_space<vmem>>, vector<1x32xf32>
    tpu.vector_store %arg11[%c3_35, %c32], %170 {strides = array<i32>} : memref<4x64xf32, #tpu.memory_space<vmem>>, vector<1x32xf32>,
    %172 = arith.truncf %170 : vector<1x32xf32> to vector<1x32xbf16>
    %cst_36 = arith.constant dense<0.000000e+00> : vector<1x128xf32>
    %173 = tpu.matmul %172, %0, %cst_36 {dimension_numbers = #tpu.dot_dimension_numbers<[1], [0], [0], [1], [0, 0, 1, 1], [], []>} : vector<1x32xbf16>, vector<32x128xbf16>, vector<1x128xf32> -> vector<1x128xf32>
    %174 = arith.addf %173, %1 : vector<1x128xf32>
    %175 = arith.negf %174 : vector<1x128xf32>
    %176 = math.exp %175 : vector<1x128xf32>
    %cst_37 = arith.constant 1.000000e+00 : f32
    %177 = vector.broadcast %cst_37 : f32 to vector<1x128xf32>
    %178 = arith.addf %177, %176 : vector<1x128xf32>
    %179 = arith.divf %177, %178 : vector<1x128xf32>
    %180 = math.tanh %174 : vector<1x128xf32>
    %181 = vector.extract_strided_slice %179 {offsets = [0, 0], sizes = [1, 32], strides = [1, 1]} : vector<1x128xf32> to vector<1x32xf32>
    %182 = vector.extract_strided_slice %179 {offsets = [0, 32], sizes = [1, 32], strides = [1, 1]} : vector<1x128xf32> to vector<1x32xf32>
    %183 = vector.extract_strided_slice %180 {offsets = [0, 64], sizes = [1, 32], strides = [1, 1]} : vector<1x128xf32> to vector<1x32xf32>
    %184 = vector.extract_strided_slice %179 {offsets = [0, 96], sizes = [1, 32], strides = [1, 1]} : vector<1x128xf32> to vector<1x32xf32>
    %185 = arith.mulf %182, %168 : vector<1x32xf32>
    %186 = arith.mulf %181, %183 : vector<1x32xf32>
    %187 = arith.addf %185, %186 : vector<1x32xf32>
    %188 = math.tanh %187 : vector<1x32xf32>
    %189 = arith.mulf %184, %188 : vector<1x32xf32>
    %c3_38 = arith.constant 3 : index
    %c32_39 = arith.constant 32 : index
    %190 = vector.load %arg12[%c3_38, %c32_39] : memref<4x64xf32, #tpu.memory_space<vmem>>, vector<1x32xf32>
    tpu.vector_store %arg12[%c3_38, %c32_39], %189 {strides = array<i32>} : memref<4x64xf32, #tpu.memory_space<vmem>>, vector<1x32xf32>,
    %191 = arith.truncf %189 : vector<1x32xf32> to vector<1x32xbf16>
    %cst_40 = arith.constant dense<0.000000e+00> : vector<1x128xf32>
    %192 = tpu.matmul %191, %0, %cst_40 {dimension_numbers = #tpu.dot_dimension_numbers<[1], [0], [0], [1], [0, 0, 1, 1], [], []>} : vector<1x32xbf16>, vector<32x128xbf16>, vector<1x128xf32> -> vector<1x128xf32>
    %193 = arith.addf %192, %1 : vector<1x128xf32>
    %194 = arith.negf %193 : vector<1x128xf32>
    %195 = math.exp %194 : vector<1x128xf32>
    %cst_41 = arith.constant 1.000000e+00 : f32
    %196 = vector.broadcast %cst_41 : f32 to vector<1x128xf32>
    %197 = arith.addf %196, %195 : vector<1x128xf32>
    %198 = arith.divf %196, %197 : vector<1x128xf32>
    %199 = math.tanh %193 : vector<1x128xf32>
    %200 = vector.extract_strided_slice %198 {offsets = [0, 0], sizes = [1, 32], strides = [1, 1]} : vector<1x128xf32> to vector<1x32xf32>
    %201 = vector.extract_strided_slice %198 {offsets = [0, 32], sizes = [1, 32], strides = [1, 1]} : vector<1x128xf32> to vector<1x32xf32>
    %202 = vector.extract_strided_slice %199 {offsets = [0, 64], sizes = [1, 32], strides = [1, 1]} : vector<1x128xf32> to vector<1x32xf32>
    %203 = vector.extract_strided_slice %198 {offsets = [0, 96], sizes = [1, 32], strides = [1, 1]} : vector<1x128xf32> to vector<1x32xf32>
    %204 = arith.mulf %201, %187 : vector<1x32xf32>
    %205 = arith.mulf %200, %202 : vector<1x32xf32>
    %206 = arith.addf %204, %205 : vector<1x32xf32>
    %207 = math.tanh %206 : vector<1x32xf32>
    %208 = arith.mulf %203, %207 : vector<1x32xf32>
    %c2_42 = arith.constant 2 : index
    %c32_43 = arith.constant 32 : index
    %209 = vector.load %arg11[%c2_42, %c32_43] : memref<4x64xf32, #tpu.memory_space<vmem>>, vector<1x32xf32>
    tpu.vector_store %arg11[%c2_42, %c32_43], %208 {strides = array<i32>} : memref<4x64xf32, #tpu.memory_space<vmem>>, vector<1x32xf32>,
    %210 = arith.truncf %208 : vector<1x32xf32> to vector<1x32xbf16>
    %cst_44 = arith.constant dense<0.000000e+00> : vector<1x128xf32>
    %211 = tpu.matmul %210, %0, %cst_44 {dimension_numbers = #tpu.dot_dimension_numbers<[1], [0], [0], [1], [0, 0, 1, 1], [], []>} : vector<1x32xbf16>, vector<32x128xbf16>, vector<1x128xf32> -> vector<1x128xf32>
    %212 = arith.addf %211, %1 : vector<1x128xf32>
    %213 = arith.negf %212 : vector<1x128xf32>
    %214 = math.exp %213 : vector<1x128xf32>
    %cst_45 = arith.constant 1.000000e+00 : f32
    %215 = vector.broadcast %cst_45 : f32 to vector<1x128xf32>
    %216 = arith.addf %215, %214 : vector<1x128xf32>
    %217 = arith.divf %215, %216 : vector<1x128xf32>
    %218 = math.tanh %212 : vector<1x128xf32>
    %219 = vector.extract_strided_slice %217 {offsets = [0, 0], sizes = [1, 32], strides = [1, 1]} : vector<1x128xf32> to vector<1x32xf32>
    %220 = vector.extract_strided_slice %217 {offsets = [0, 32], sizes = [1, 32], strides = [1, 1]} : vector<1x128xf32> to vector<1x32xf32>
    %221 = vector.extract_strided_slice %218 {offsets = [0, 64], sizes = [1, 32], strides = [1, 1]} : vector<1x128xf32> to vector<1x32xf32>
    %222 = vector.extract_strided_slice %217 {offsets = [0, 96], sizes = [1, 32], strides = [1, 1]} : vector<1x128xf32> to vector<1x32xf32>
    %223 = arith.mulf %220, %206 : vector<1x32xf32>
    %224 = arith.mulf %219, %221 : vector<1x32xf32>
    %225 = arith.addf %223, %224 : vector<1x32xf32>
    %226 = math.tanh %225 : vector<1x32xf32>
    %227 = arith.mulf %222, %226 : vector<1x32xf32>
    %c2_46 = arith.constant 2 : index
    %c32_47 = arith.constant 32 : index
    %228 = vector.load %arg12[%c2_46, %c32_47] : memref<4x64xf32, #tpu.memory_space<vmem>>, vector<1x32xf32>
    tpu.vector_store %arg12[%c2_46, %c32_47], %227 {strides = array<i32>} : memref<4x64xf32, #tpu.memory_space<vmem>>, vector<1x32xf32>,
    %229 = arith.truncf %227 : vector<1x32xf32> to vector<1x32xbf16>
    %cst_48 = arith.constant dense<0.000000e+00> : vector<1x128xf32>
    %230 = tpu.matmul %229, %0, %cst_48 {dimension_numbers = #tpu.dot_dimension_numbers<[1], [0], [0], [1], [0, 0, 1, 1], [], []>} : vector<1x32xbf16>, vector<32x128xbf16>, vector<1x128xf32> -> vector<1x128xf32>
    %231 = arith.addf %230, %1 : vector<1x128xf32>
    %232 = arith.negf %231 : vector<1x128xf32>
    %233 = math.exp %232 : vector<1x128xf32>
    %cst_49 = arith.constant 1.000000e+00 : f32
    %234 = vector.broadcast %cst_49 : f32 to vector<1x128xf32>
    %235 = arith.addf %234, %233 : vector<1x128xf32>
    %236 = arith.divf %234, %235 : vector<1x128xf32>
    %237 = math.tanh %231 : vector<1x128xf32>
    %238 = vector.extract_strided_slice %236 {offsets = [0, 0], sizes = [1, 32], strides = [1, 1]} : vector<1x128xf32> to vector<1x32xf32>
    %239 = vector.extract_strided_slice %236 {offsets = [0, 32], sizes = [1, 32], strides = [1, 1]} : vector<1x128xf32> to vector<1x32xf32>
    %240 = vector.extract_strided_slice %237 {offsets = [0, 64], sizes = [1, 32], strides = [1, 1]} : vector<1x128xf32> to vector<1x32xf32>
    %241 = vector.extract_strided_slice %236 {offsets = [0, 96], sizes = [1, 32], strides = [1, 1]} : vector<1x128xf32> to vector<1x32xf32>
    %242 = arith.mulf %239, %225 : vector<1x32xf32>
    %243 = arith.mulf %238, %240 : vector<1x32xf32>
    %244 = arith.addf %242, %243 : vector<1x32xf32>
    %245 = math.tanh %244 : vector<1x32xf32>
    %246 = arith.mulf %241, %245 : vector<1x32xf32>
    %c1_50 = arith.constant 1 : index
    %c32_51 = arith.constant 32 : index
    %247 = vector.load %arg11[%c1_50, %c32_51] : memref<4x64xf32, #tpu.memory_space<vmem>>, vector<1x32xf32>
    tpu.vector_store %arg11[%c1_50, %c32_51], %246 {strides = array<i32>} : memref<4x64xf32, #tpu.memory_space<vmem>>, vector<1x32xf32>,
    %248 = arith.truncf %246 : vector<1x32xf32> to vector<1x32xbf16>
    %cst_52 = arith.constant dense<0.000000e+00> : vector<1x128xf32>
    %249 = tpu.matmul %248, %0, %cst_52 {dimension_numbers = #tpu.dot_dimension_numbers<[1], [0], [0], [1], [0, 0, 1, 1], [], []>} : vector<1x32xbf16>, vector<32x128xbf16>, vector<1x128xf32> -> vector<1x128xf32>
    %250 = arith.addf %249, %1 : vector<1x128xf32>
    %251 = arith.negf %250 : vector<1x128xf32>
    %252 = math.exp %251 : vector<1x128xf32>
    %cst_53 = arith.constant 1.000000e+00 : f32
    %253 = vector.broadcast %cst_53 : f32 to vector<1x128xf32>
    %254 = arith.addf %253, %252 : vector<1x128xf32>
    %255 = arith.divf %253, %254 : vector<1x128xf32>
    %256 = math.tanh %250 : vector<1x128xf32>
    %257 = vector.extract_strided_slice %255 {offsets = [0, 0], sizes = [1, 32], strides = [1, 1]} : vector<1x128xf32> to vector<1x32xf32>
    %258 = vector.extract_strided_slice %255 {offsets = [0, 32], sizes = [1, 32], strides = [1, 1]} : vector<1x128xf32> to vector<1x32xf32>
    %259 = vector.extract_strided_slice %256 {offsets = [0, 64], sizes = [1, 32], strides = [1, 1]} : vector<1x128xf32> to vector<1x32xf32>
    %260 = vector.extract_strided_slice %255 {offsets = [0, 96], sizes = [1, 32], strides = [1, 1]} : vector<1x128xf32> to vector<1x32xf32>
    %261 = arith.mulf %258, %244 : vector<1x32xf32>
    %262 = arith.mulf %257, %259 : vector<1x32xf32>
    %263 = arith.addf %261, %262 : vector<1x32xf32>
    %264 = math.tanh %263 : vector<1x32xf32>
    %265 = arith.mulf %260, %264 : vector<1x32xf32>
    %c1_54 = arith.constant 1 : index
    %c32_55 = arith.constant 32 : index
    %266 = vector.load %arg12[%c1_54, %c32_55] : memref<4x64xf32, #tpu.memory_space<vmem>>, vector<1x32xf32>
    tpu.vector_store %arg12[%c1_54, %c32_55], %265 {strides = array<i32>} : memref<4x64xf32, #tpu.memory_space<vmem>>, vector<1x32xf32>,
    %267 = arith.truncf %265 : vector<1x32xf32> to vector<1x32xbf16>
    %cst_56 = arith.constant dense<0.000000e+00> : vector<1x128xf32>
    %268 = tpu.matmul %267, %0, %cst_56 {dimension_numbers = #tpu.dot_dimension_numbers<[1], [0], [0], [1], [0, 0, 1, 1], [], []>} : vector<1x32xbf16>, vector<32x128xbf16>, vector<1x128xf32> -> vector<1x128xf32>
    %269 = arith.addf %268, %1 : vector<1x128xf32>
    %270 = arith.negf %269 : vector<1x128xf32>
    %271 = math.exp %270 : vector<1x128xf32>
    %cst_57 = arith.constant 1.000000e+00 : f32
    %272 = vector.broadcast %cst_57 : f32 to vector<1x128xf32>
    %273 = arith.addf %272, %271 : vector<1x128xf32>
    %274 = arith.divf %272, %273 : vector<1x128xf32>
    %275 = math.tanh %269 : vector<1x128xf32>
    %276 = vector.extract_strided_slice %274 {offsets = [0, 0], sizes = [1, 32], strides = [1, 1]} : vector<1x128xf32> to vector<1x32xf32>
    %277 = vector.extract_strided_slice %274 {offsets = [0, 32], sizes = [1, 32], strides = [1, 1]} : vector<1x128xf32> to vector<1x32xf32>
    %278 = vector.extract_strided_slice %275 {offsets = [0, 64], sizes = [1, 32], strides = [1, 1]} : vector<1x128xf32> to vector<1x32xf32>
    %279 = vector.extract_strided_slice %274 {offsets = [0, 96], sizes = [1, 32], strides = [1, 1]} : vector<1x128xf32> to vector<1x32xf32>
    %280 = arith.mulf %277, %263 : vector<1x32xf32>
    %281 = arith.mulf %276, %278 : vector<1x32xf32>
    %282 = arith.addf %280, %281 : vector<1x32xf32>
    %283 = math.tanh %282 : vector<1x32xf32>
    %284 = arith.mulf %279, %283 : vector<1x32xf32>
    %c0_58 = arith.constant 0 : index
    %c32_59 = arith.constant 32 : index
    %285 = vector.load %arg11[%c0_58, %c32_59] : memref<4x64xf32, #tpu.memory_space<vmem>>, vector<1x32xf32>
    tpu.vector_store %arg11[%c0_58, %c32_59], %284 {strides = array<i32>} : memref<4x64xf32, #tpu.memory_space<vmem>>, vector<1x32xf32>,
    %286 = arith.truncf %284 : vector<1x32xf32> to vector<1x32xbf16>
    %cst_60 = arith.constant dense<0.000000e+00> : vector<1x128xf32>
    %287 = tpu.matmul %286, %0, %cst_60 {dimension_numbers = #tpu.dot_dimension_numbers<[1], [0], [0], [1], [0, 0, 1, 1], [], []>} : vector<1x32xbf16>, vector<32x128xbf16>, vector<1x128xf32> -> vector<1x128xf32>
    %288 = arith.addf %287, %1 : vector<1x128xf32>
    %289 = arith.negf %288 : vector<1x128xf32>
    %290 = math.exp %289 : vector<1x128xf32>
    %cst_61 = arith.constant 1.000000e+00 : f32
    %291 = vector.broadcast %cst_61 : f32 to vector<1x128xf32>
    %292 = arith.addf %291, %290 : vector<1x128xf32>
    %293 = arith.divf %291, %292 : vector<1x128xf32>
    %294 = math.tanh %288 : vector<1x128xf32>
    %295 = vector.extract_strided_slice %293 {offsets = [0, 0], sizes = [1, 32], strides = [1, 1]} : vector<1x128xf32> to vector<1x32xf32>
    %296 = vector.extract_strided_slice %293 {offsets = [0, 32], sizes = [1, 32], strides = [1, 1]} : vector<1x128xf32> to vector<1x32xf32>
    %297 = vector.extract_strided_slice %294 {offsets = [0, 64], sizes = [1, 32], strides = [1, 1]} : vector<1x128xf32> to vector<1x32xf32>
    %298 = vector.extract_strided_slice %293 {offsets = [0, 96], sizes = [1, 32], strides = [1, 1]} : vector<1x128xf32> to vector<1x32xf32>
    %299 = arith.mulf %296, %282 : vector<1x32xf32>
    %300 = arith.mulf %295, %297 : vector<1x32xf32>
    %301 = arith.addf %299, %300 : vector<1x32xf32>
    %302 = math.tanh %301 : vector<1x32xf32>
    %303 = arith.mulf %298, %302 : vector<1x32xf32>
    %c0_62 = arith.constant 0 : index
    %c32_63 = arith.constant 32 : index
    %304 = vector.load %arg12[%c0_62, %c32_63] : memref<4x64xf32, #tpu.memory_space<vmem>>, vector<1x32xf32>
    tpu.vector_store %arg12[%c0_62, %c32_63], %303 {strides = array<i32>} : memref<4x64xf32, #tpu.memory_space<vmem>>, vector<1x32xf32>,
    %c0_64 = arith.constant 0 : index
    %c0_65 = arith.constant 0 : index
    %305 = vector.load %arg0[%c0_64, %c0_65] : memref<4x1xi32, #tpu.memory_space<vmem>>, vector<4x1xi32>
    %c0_66 = arith.constant 0 : index
    %c0_67 = arith.constant 0 : index
    %306 = vector.load %arg11[%c0_66, %c0_67] : memref<4x64xf32, #tpu.memory_space<vmem>>, vector<4x64xf32>
    %307 = arith.truncf %306 : vector<4x64xf32> to vector<4x64xbf16>
    %308 = vector.extract_strided_slice %307 {offsets = [0, 0], sizes = [1, 64], strides = [1, 1]} : vector<4x64xbf16> to vector<1x64xbf16>
    %c0_68 = arith.constant 0 : index
    %c0_69 = arith.constant 0 : index
    %c0_70 = arith.constant 0 : index
    %309 = vector.load %arg5[%c0_68, %c0_69, %c0_70] : memref<4x64x10xbf16, #tpu.memory_space<vmem>>, vector<1x64x10xbf16>
    %310 = vector.shape_cast %309 : vector<1x64x10xbf16> to vector<64x10xbf16>
    %cst_71 = arith.constant dense<0.000000e+00> : vector<1x10xf32>
    %311 = tpu.matmul %308, %310, %cst_71 {dimension_numbers = #tpu.dot_dimension_numbers<[1], [0], [0], [1], [0, 0, 1, 1], [], []>} : vector<1x64xbf16>, vector<64x10xbf16>, vector<1x10xf32> -> vector<1x10xf32>
    %312 = vector.extract_strided_slice %307 {offsets = [1, 0], sizes = [1, 64], strides = [1, 1]} : vector<4x64xbf16> to vector<1x64xbf16>
    %c1_72 = arith.constant 1 : index
    %c0_73 = arith.constant 0 : index
    %c0_74 = arith.constant 0 : index
    %313 = vector.load %arg5[%c1_72, %c0_73, %c0_74] : memref<4x64x10xbf16, #tpu.memory_space<vmem>>, vector<1x64x10xbf16>
    %314 = vector.shape_cast %313 : vector<1x64x10xbf16> to vector<64x10xbf16>
    %cst_75 = arith.constant dense<0.000000e+00> : vector<1x10xf32>
    %315 = tpu.matmul %312, %314, %cst_75 {dimension_numbers = #tpu.dot_dimension_numbers<[1], [0], [0], [1], [0, 0, 1, 1], [], []>} : vector<1x64xbf16>, vector<64x10xbf16>, vector<1x10xf32> -> vector<1x10xf32>
    %316 = vector.extract_strided_slice %307 {offsets = [2, 0], sizes = [1, 64], strides = [1, 1]} : vector<4x64xbf16> to vector<1x64xbf16>
    %c2_76 = arith.constant 2 : index
    %c0_77 = arith.constant 0 : index
    %c0_78 = arith.constant 0 : index
    %317 = vector.load %arg5[%c2_76, %c0_77, %c0_78] : memref<4x64x10xbf16, #tpu.memory_space<vmem>>, vector<1x64x10xbf16>
    %318 = vector.shape_cast %317 : vector<1x64x10xbf16> to vector<64x10xbf16>
    %cst_79 = arith.constant dense<0.000000e+00> : vector<1x10xf32>
    %319 = tpu.matmul %316, %318, %cst_79 {dimension_numbers = #tpu.dot_dimension_numbers<[1], [0], [0], [1], [0, 0, 1, 1], [], []>} : vector<1x64xbf16>, vector<64x10xbf16>, vector<1x10xf32> -> vector<1x10xf32>
    %320 = vector.extract_strided_slice %307 {offsets = [3, 0], sizes = [1, 64], strides = [1, 1]} : vector<4x64xbf16> to vector<1x64xbf16>
    %c3_80 = arith.constant 3 : index
    %c0_81 = arith.constant 0 : index
    %c0_82 = arith.constant 0 : index
    %321 = vector.load %arg5[%c3_80, %c0_81, %c0_82] : memref<4x64x10xbf16, #tpu.memory_space<vmem>>, vector<1x64x10xbf16>
    %322 = vector.shape_cast %321 : vector<1x64x10xbf16> to vector<64x10xbf16>
    %cst_83 = arith.constant dense<0.000000e+00> : vector<1x10xf32>
    %323 = tpu.matmul %320, %322, %cst_83 {dimension_numbers = #tpu.dot_dimension_numbers<[1], [0], [0], [1], [0, 0, 1, 1], [], []>} : vector<1x64xbf16>, vector<64x10xbf16>, vector<1x10xf32> -> vector<1x10xf32>
    %324 = tpu.concatenate %311, %315, %319, %323 in 0 : vector<1x10xf32>, vector<1x10xf32>, vector<1x10xf32>, vector<1x10xf32> -> vector<4x10xf32>
    %c0_84 = arith.constant 0 : index
    %c0_85 = arith.constant 0 : index
    %325 = vector.load %arg6[%c0_84, %c0_85] : memref<4x10xf32, #tpu.memory_space<vmem>>, vector<4x10xf32>
    %326 = arith.addf %324, %325 : vector<4x10xf32>
    %cst_86 = arith.constant dense<0xFF800000> : vector<4xf32>
    %327 = vector.multi_reduction <maximumf>, %326, %cst_86 [1] : vector<4x10xf32> to vector<4xf32>
    %328 = vector.shape_cast %327 : vector<4xf32> to vector<4x1xf32>
    %329 = vector.broadcast %328 : vector<4x1xf32> to vector<4x10xf32>
    %330 = arith.subf %326, %329 : vector<4x10xf32>
    %331 = math.exp %330 : vector<4x10xf32>
    %cst_87 = arith.constant dense<0.000000e+00> : vector<4xf32>
    %332 = vector.multi_reduction <add>, %331, %cst_87 [1] : vector<4x10xf32> to vector<4xf32>
    %333 = vector.shape_cast %332 : vector<4xf32> to vector<4x1xf32>
    %334 = tpu.reciprocal %333 {approx = true} : vector<4x1xf32> -> vector<4x1xf32>
    %335 = vector.broadcast %334 : vector<4x1xf32> to vector<4x10xf32>
    %336 = arith.mulf %331, %335 : vector<4x10xf32>
    %337 = math.log %333 : vector<4x1xf32>
    %338 = vector.broadcast %337 : vector<4x1xf32> to vector<4x10xf32>
    %339 = arith.subf %330, %338 : vector<4x10xf32>
    %340 = arith.mulf %336, %339 : vector<4x10xf32>
    %cst_88 = arith.constant dense<0.000000e+00> : vector<4xf32>
    %341 = vector.multi_reduction <add>, %340, %cst_88 [1] : vector<4x10xf32> to vector<4xf32>
    %342 = vector.shape_cast %341 : vector<4xf32> to vector<4x1xf32>
    %cst_89 = arith.constant 0.000000e+00 : f32
    %343 = vector.broadcast %cst_89 : f32 to vector<4x1xf32>
    %344 = arith.subf %343, %342 : vector<4x1xf32>
    %345 = tpu.iota {dimensions = array<i32: 1>} : vector<4x10xi32>
    %346 = vector.broadcast %305 : vector<4x1xi32> to vector<4x10xi32>
    %347 = arith.cmpi eq, %345, %346 : vector<4x10xi32>
    %cst_90 = arith.constant 0.000000e+00 : f32
    %348 = vector.broadcast %cst_90 : f32 to vector<4x10xf32>
    %349 = arith.select %347, %339, %348 : vector<4x10xi1>, vector<4x10xf32>
    %cst_91 = arith.constant dense<0.000000e+00> : vector<4xf32>
    %350 = vector.multi_reduction <add>, %349, %cst_91 [1] : vector<4x10xf32> to vector<4xf32>
    %351 = vector.shape_cast %350 : vector<4xf32> to vector<4x1xf32>
    %352 = vector.shape_cast %344 : vector<4x1xf32> to vector<1x4x1xf32>
    %cst_92 = arith.constant dense<0.000000e+00> : vector<1xf32>
    %353 = vector.multi_reduction <add>, %352, %cst_92 [1, 2] : vector<1x4x1xf32> to vector<1xf32>
    %354 = vector.shape_cast %353 : vector<1xf32> to vector<1x1x1xf32>
    %355 = vector.extract %354[0, 0, 0] : f32 from vector<1x1x1xf32>
    %356 = vector.shape_cast %351 : vector<4x1xf32> to vector<1x4x1xf32>
    %cst_93 = arith.constant dense<0.000000e+00> : vector<1xf32>
    %357 = vector.multi_reduction <add>, %356, %cst_93 [1, 2] : vector<1x4x1xf32> to vector<1xf32>
    %358 = vector.shape_cast %357 : vector<1xf32> to vector<1x1x1xf32>
    %359 = vector.extract %358[0, 0, 0] : f32 from vector<1x1x1xf32>
    %c0_94 = arith.constant 0 : index
    %c0_95 = arith.constant 0 : index
    %360 = vector.load %arg1[%c0_94, %c0_95] : memref<4x1xi32, #tpu.memory_space<vmem>>, vector<4x1xi32>
    %c0_96 = arith.constant 0 : index
    %c0_97 = arith.constant 0 : index
    %361 = vector.load %arg12[%c0_96, %c0_97] : memref<4x64xf32, #tpu.memory_space<vmem>>, vector<4x64xf32>
    %362 = arith.truncf %361 : vector<4x64xf32> to vector<4x64xbf16>
    %363 = vector.extract_strided_slice %362 {offsets = [0, 0], sizes = [1, 64], strides = [1, 1]} : vector<4x64xbf16> to vector<1x64xbf16>
    %c0_98 = arith.constant 0 : index
    %c0_99 = arith.constant 0 : index
    %c0_100 = arith.constant 0 : index
    %364 = vector.load %arg7[%c0_98, %c0_99, %c0_100] : memref<4x64x6xbf16, #tpu.memory_space<vmem>>, vector<1x64x6xbf16>
    %365 = vector.shape_cast %364 : vector<1x64x6xbf16> to vector<64x6xbf16>
    %cst_101 = arith.constant dense<0.000000e+00> : vector<1x6xf32>
    %366 = tpu.matmul %363, %365, %cst_101 {dimension_numbers = #tpu.dot_dimension_numbers<[1], [0], [0], [1], [0, 0, 1, 1], [], []>} : vector<1x64xbf16>, vector<64x6xbf16>, vector<1x6xf32> -> vector<1x6xf32>
    %367 = vector.extract_strided_slice %362 {offsets = [1, 0], sizes = [1, 64], strides = [1, 1]} : vector<4x64xbf16> to vector<1x64xbf16>
    %c1_102 = arith.constant 1 : index
    %c0_103 = arith.constant 0 : index
    %c0_104 = arith.constant 0 : index
    %368 = vector.load %arg7[%c1_102, %c0_103, %c0_104] : memref<4x64x6xbf16, #tpu.memory_space<vmem>>, vector<1x64x6xbf16>
    %369 = vector.shape_cast %368 : vector<1x64x6xbf16> to vector<64x6xbf16>
    %cst_105 = arith.constant dense<0.000000e+00> : vector<1x6xf32>
    %370 = tpu.matmul %367, %369, %cst_105 {dimension_numbers = #tpu.dot_dimension_numbers<[1], [0], [0], [1], [0, 0, 1, 1], [], []>} : vector<1x64xbf16>, vector<64x6xbf16>, vector<1x6xf32> -> vector<1x6xf32>
    %371 = vector.extract_strided_slice %362 {offsets = [2, 0], sizes = [1, 64], strides = [1, 1]} : vector<4x64xbf16> to vector<1x64xbf16>
    %c2_106 = arith.constant 2 : index
    %c0_107 = arith.constant 0 : index
    %c0_108 = arith.constant 0 : index
    %372 = vector.load %arg7[%c2_106, %c0_107, %c0_108] : memref<4x64x6xbf16, #tpu.memory_space<vmem>>, vector<1x64x6xbf16>
    %373 = vector.shape_cast %372 : vector<1x64x6xbf16> to vector<64x6xbf16>
    %cst_109 = arith.constant dense<0.000000e+00> : vector<1x6xf32>
    %374 = tpu.matmul %371, %373, %cst_109 {dimension_numbers = #tpu.dot_dimension_numbers<[1], [0], [0], [1], [0, 0, 1, 1], [], []>} : vector<1x64xbf16>, vector<64x6xbf16>, vector<1x6xf32> -> vector<1x6xf32>
    %375 = vector.extract_strided_slice %362 {offsets = [3, 0], sizes = [1, 64], strides = [1, 1]} : vector<4x64xbf16> to vector<1x64xbf16>
    %c3_110 = arith.constant 3 : index
    %c0_111 = arith.constant 0 : index
    %c0_112 = arith.constant 0 : index
    %376 = vector.load %arg7[%c3_110, %c0_111, %c0_112] : memref<4x64x6xbf16, #tpu.memory_space<vmem>>, vector<1x64x6xbf16>
    %377 = vector.shape_cast %376 : vector<1x64x6xbf16> to vector<64x6xbf16>
    %cst_113 = arith.constant dense<0.000000e+00> : vector<1x6xf32>
    %378 = tpu.matmul %375, %377, %cst_113 {dimension_numbers = #tpu.dot_dimension_numbers<[1], [0], [0], [1], [0, 0, 1, 1], [], []>} : vector<1x64xbf16>, vector<64x6xbf16>, vector<1x6xf32> -> vector<1x6xf32>
    %379 = tpu.concatenate %366, %370, %374, %378 in 0 : vector<1x6xf32>, vector<1x6xf32>, vector<1x6xf32>, vector<1x6xf32> -> vector<4x6xf32>
    %c0_114 = arith.constant 0 : index
    %c0_115 = arith.constant 0 : index
    %380 = vector.load %arg8[%c0_114, %c0_115] : memref<4x6xf32, #tpu.memory_space<vmem>>, vector<4x6xf32>
    %381 = arith.addf %379, %380 : vector<4x6xf32>
    %cst_116 = arith.constant dense<0xFF800000> : vector<4xf32>
    %382 = vector.multi_reduction <maximumf>, %381, %cst_116 [1] : vector<4x6xf32> to vector<4xf32>
    %383 = vector.shape_cast %382 : vector<4xf32> to vector<4x1xf32>
    %384 = vector.broadcast %383 : vector<4x1xf32> to vector<4x6xf32>
    %385 = arith.subf %381, %384 : vector<4x6xf32>
    %386 = math.exp %385 : vector<4x6xf32>
    %cst_117 = arith.constant dense<0.000000e+00> : vector<4xf32>
    %387 = vector.multi_reduction <add>, %386, %cst_117 [1] : vector<4x6xf32> to vector<4xf32>
    %388 = vector.shape_cast %387 : vector<4xf32> to vector<4x1xf32>
    %389 = tpu.reciprocal %388 {approx = true} : vector<4x1xf32> -> vector<4x1xf32>
    %390 = vector.broadcast %389 : vector<4x1xf32> to vector<4x6xf32>
    %391 = arith.mulf %386, %390 : vector<4x6xf32>
    %392 = math.log %388 : vector<4x1xf32>
    %393 = vector.broadcast %392 : vector<4x1xf32> to vector<4x6xf32>
    %394 = arith.subf %385, %393 : vector<4x6xf32>
    %395 = arith.mulf %391, %394 : vector<4x6xf32>
    %cst_118 = arith.constant dense<0.000000e+00> : vector<4xf32>
    %396 = vector.multi_reduction <add>, %395, %cst_118 [1] : vector<4x6xf32> to vector<4xf32>
    %397 = vector.shape_cast %396 : vector<4xf32> to vector<4x1xf32>
    %cst_119 = arith.constant 0.000000e+00 : f32
    %398 = vector.broadcast %cst_119 : f32 to vector<4x1xf32>
    %399 = arith.subf %398, %397 : vector<4x1xf32>
    %400 = tpu.iota {dimensions = array<i32: 1>} : vector<4x6xi32>
    %401 = vector.broadcast %360 : vector<4x1xi32> to vector<4x6xi32>
    %402 = arith.cmpi eq, %400, %401 : vector<4x6xi32>
    %cst_120 = arith.constant 0.000000e+00 : f32
    %403 = vector.broadcast %cst_120 : f32 to vector<4x6xf32>
    %404 = arith.select %402, %394, %403 : vector<4x6xi1>, vector<4x6xf32>
    %cst_121 = arith.constant dense<0.000000e+00> : vector<4xf32>
    %405 = vector.multi_reduction <add>, %404, %cst_121 [1] : vector<4x6xf32> to vector<4xf32>
    %406 = vector.shape_cast %405 : vector<4xf32> to vector<4x1xf32>
    %c1_i32 = arith.constant 1 : i32
    %407 = vector.broadcast %c1_i32 : i32 to vector<4x1xi32>
    %408 = arith.cmpi eq, %305, %407 : vector<4x1xi32>
    %cst_122 = arith.constant 0.000000e+00 : f32
    %409 = vector.broadcast %cst_122 : f32 to vector<4x1xf32>
    %410 = arith.select %408, %399, %409 : vector<4x1xi1>, vector<4x1xf32>
    %411 = vector.shape_cast %410 : vector<4x1xf32> to vector<1x4x1xf32>
    %cst_123 = arith.constant dense<0.000000e+00> : vector<1xf32>
    %412 = vector.multi_reduction <add>, %411, %cst_123 [1, 2] : vector<1x4x1xf32> to vector<1xf32>
    %413 = vector.shape_cast %412 : vector<1xf32> to vector<1x1x1xf32>
    %414 = vector.extract %413[0, 0, 0] : f32 from vector<1x1x1xf32>
    %415 = arith.addf %355, %414 : f32
    %cst_124 = arith.constant 0.000000e+00 : f32
    %416 = vector.broadcast %cst_124 : f32 to vector<4x1xf32>
    %417 = arith.select %408, %406, %416 : vector<4x1xi1>, vector<4x1xf32>
    %418 = vector.shape_cast %417 : vector<4x1xf32> to vector<1x4x1xf32>
    %cst_125 = arith.constant dense<0.000000e+00> : vector<1xf32>
    %419 = vector.multi_reduction <add>, %418, %cst_125 [1, 2] : vector<1x4x1xf32> to vector<1xf32>
    %420 = vector.shape_cast %419 : vector<1xf32> to vector<1x1x1xf32>
    %421 = vector.extract %420[0, 0, 0] : f32 from vector<1x1x1xf32>
    %422 = arith.addf %359, %421 : f32
    %c0_126 = arith.constant 0 : index
    %423 = memref.load %arg9[%c0_126] : memref<1xf32, #tpu.memory_space<smem>>
    memref.store %415, %arg9[%c0_126] : memref<1xf32, #tpu.memory_space<smem>>
    %c0_127 = arith.constant 0 : index
    %424 = memref.load %arg10[%c0_127] : memref<1xf32, #tpu.memory_space<smem>>
    memref.store %422, %arg10[%c0_127] : memref<1xf32, #tpu.memory_space<smem>>
    return
  }
}

</mosaic_0001>

<bundles_post_ra>
// kernel: tpu_custom_call.1
= control target key start
LH: loop header
LB: loop body
LE: loop exit
PB: predicated region body
PF: predicated region fallthrough
CT: control target
= control target key end

     0   :  { %16 = vsyncpa [#allocation5], 0  ;;  %s2655_s15 = smov 64   ;;  %s3234_s0 = inlined_call_operand.vmem [shape: s32[4,1], index: 0, kind: input, shape index: {}]   ;;  %s3235_s1 = inlined_call_operand.vmem [shape: s32[4,1], index: 1, kind: input, shape index: {}]   ;;  %s3236_s2 = inlined_call_operand.vmem [shape: f32[1,128], index: 2, kind: input, shape index: {}]   ;;  %s3237_s3 = inlined_call_operand.vmem [shape: bf16[32,128], index: 3, kind: input, shape index: {}]   ;;  %s3238_s4 = inlined_call_operand.vmem [shape: f32[1,128], index: 4, kind: input, shape index: {}]   ;;  %s3239_s5 = inlined_call_operand.vmem [shape: bf16[4,64,10], index: 5, kind: input, shape index: {}]   ;;  %s3240_s6 = inlined_call_operand.vmem [shape: f32[4,10], index: 6, kind: input, shape index: {}]   ;;  %s3241_s7 = inlined_call_operand.vmem [shape: bf16[4,64,6], index: 7, kind: input, shape index: {}]   ;;  %s3242_s8 = inlined_call_operand.vmem [shape: f32[4,6], index: 8, kind: input, shape index: {}]   ;;  %s3243_s9 = inlined_call_operand.hbm [shape: f32[1], index: 9, kind: output, shape index: {0}]   ;;  %s3244_s10 = inlined_call_operand.hbm [shape: f32[1], index: 10, kind: output, shape index: {1}]  }
   0x1   :  { %v42_v0 = vld [vmem:[%s3236_s2] sm:$0x1] }
   0x2   :  { %2491 = vtanh.f32 %v42_v0 }
   0xc   :  { %v2492_v1 = vpop.eup %2491 }
   0xd   :  { %52 = vrot.lane.b32.xlu0 %v2492_v1, %s2655_s15 }
   0xe   :  { %17 = vsyncpa [#allocation7], 0  ;;  %v2018_v2 = vmul.f32 -1.442695, %v42_v0  ;;  %s2656_s16 = smov 32   ;;  %v2725_v11 = vld [vmem:[%s3237_s3] sm:$0xff]  }
   0xf   :  { %v2657_v12 = vmov 0.0   ;;  %vm2658_vm0 = vmmov 0   ;;  %v2734_v13 = vld [vmem:[%s3237_s3 + $0x8] sm:$0xff]   ;;  %vm93_vm1 = vcmask 261120   ;;  %v2762_v19 = vld [vmem:[%s3238_s4] sm:$0x1] }
  0x10   :  { %2493 = vpow2.f32 %v2018_v2  ;;  %2224 = vmatprep.subr.bf16.mxu0 %v2657_v12  ;;  %2228 = vmatprep.mubr.msk.bf16.mxu0 %vm2658_vm0, %v2657_v12  ;;  %vm75_vm2 = vcmask 253952   ;;  %vm697_vm3 = vcmask 516352   ;;  %vm1266_vm4 = vcmask 523264   ;;  %s2631_s24 = scalar_lea.hbm %s3243_s9, 16 }
  0x11   :  { %2225 = vmatpush3.bf16.msra.mxu0 %v2725_v11  ;;  %2232 = vmatprep.subr.bf16.mxu1 %v2657_v12  ;;  %vm1552_vm5 = vcmask 1040384   ;;  %vm1554_vm6 = vcmask 1041408   ;;  %vm1556_vm7 = vcmask 1042432   ;;  %vm1560_vm8 = vcmask 76800   ;;  %p2632_p0 = scmp.ne.s32.totalorder %s3243_s9, %s2631_s24  ;;  %p2635_p1 = scmp.lt.u32.totalorder %s2631_s24, %s3243_s9 }
  0x12   :  { %2226 = vmatprep.subr.bf16.mxu0 %v2657_v12  ;;  %2233 = vmatpush3.bf16.msra.mxu1 %v2725_v11  ;;  %vm1936_vm9 = vcmask 44032   ;;  %vm1590_vm12 = vcmask 3072  }
  0x13   :  { %2234 = vmatprep.subr.bf16.mxu1 %v2657_v12  ;;  %2236 = vmatprep.mubr.msk.bf16.mxu1 %vm2658_vm0, %v2657_v12  ;;  %p2637_p2 = pnand %p2635_p1, %p2632_p0 }
  0x15   :  { %2227 = vmatpush3.bf16.msra.mxu0 %v2734_v13 }
  0x16   :  { %2235 = vmatpush3.bf16.msra.mxu1 %v2734_v13  ;;  %2240 = vmatprep.subr.bf16.mxu0 %v2657_v12 }
  0x17   :  { %2248 = vmatprep.subr.bf16.mxu1 %v2657_v12 }
  0x1a   :  { %v2494_v3 = vpop.eup %2493 }
  0x1b   :  { %v46_v4 = vadd.f32 1.0, %v2494_v3 }
  0x1d   :  { %2495 = vrcp.f32 %v46_v4 }
  0x27   :  { %v2496_v5 = vpop.eup %2495 }
  0x28   :  { %v50_v8 = vmul.f32 0.0, %v2496_v5 }
  0x7f   :  { %v53_v6 = vpop.permute.xlu0 %52 }
  0x80   :  { %v55_v7 = vmul.f32 %v2496_v5, %v53_v6 }
  0x82   :  { %57 = vrot.lane.b32.xlu0 %v55_v7, %s2656_s16 }
  0xf4   :  { %v58_v9 = vpop.permute.xlu0 %57 }
  0xf5   :  { %v60_v10 = vadd.f32 %v58_v9, %v50_v8 }
  0xf7   :  { %2497 = vtanh.f32 %v60_v10 }
 0x101   :  { %v2498_v14 = vpop.eup %2497 }
 0x102   :  { %63 = vrot.lane.b32.xlu1 %v2498_v14, %s2655_s15 }
 0x174   :  { %v64_v15 = vpop.permute.xlu1 %63 }
 0x175   :  { %v2747_v16 = vmul.f32 %v2496_v5, %v64_v15 }
 0x177   :  { %v77_v17 = vpack.c.bf16 %v2747_v16, %v2747_v16 }
 0x179   :  { %79 = vrot.lane.b32.xlu1 %v77_v17, %s2656_s16 }
 0x1eb   :  { %v80_v18 = vpop.permute.xlu1 %79 }
 0x1ec   :  { %2229 = vmatmul.mubr.msk.bf16.vlgmr.msra.gmra.mrb[0].mxu0 %vm93_vm1, %v80_v18 }
 0x1ed   :  { %2241 = vmatpush3.bf16.msra.mxu0 %v2725_v11  ;;  %2244 = vmatprep.mubr.msk.bf16.mxu0 %vm2658_vm0, %v2657_v12 }
 0x1ee   :  { %2242 = vmatprep.subr.bf16.mxu0 %v2657_v12 }
 0x1f1   :  { %2243 = vmatpush3.bf16.msra.mxu0 %v2734_v13 }
 0x1f2   :  { %2256 = vmatprep.subr.bf16.mxu0 %v2657_v12 }
 0x2bf   :  { %v131_v20 = vpop.f32.mrb[0].mxu0 }
 0x2c0   :  { %v132_v21 = vadd.f32 %v131_v20, %v2762_v19  ;;  %v2230_v22 = vpop.f32.mrb[1].mxu0 }
 0x2c1   :  { %v134_v23 = vpop.f32.mrb[2].mxu0 }
 0x2c2   :  { %2499 = vtanh.f32 %v132_v21  ;;  %v2231_v24 = vpop.f32.mrb[3].mxu0  ;;  %v2022_v26 = vmul.f32 -1.442695, %v132_v21 }
 0x2c4   :  { %2501 = vpow2.f32 %v2022_v26 }
 0x2cc   :  { %v2500_v25 = vpop.eup %2499 }
 0x2cd   :  { %146 = vrot.lane.b32.xlu0 %v2500_v25, %s2655_s15 }
 0x2ce   :  { %v2502_v27 = vpop.eup %2501 }
 0x2cf   :  { %v140_v28 = vadd.f32 1.0, %v2502_v27 }
 0x2d1   :  { %2503 = vrcp.f32 %v140_v28 }
 0x2db   :  { %v2504_v29 = vpop.eup %2503 }
 0x2dc   :  { %v144_v32 = vmul.f32 %v2504_v29, %v60_v10 }
 0x33f   :  { %v147_v30 = vpop.permute.xlu0 %146 }
 0x340   :  { %v149_v31 = vmul.f32 %v2504_v29, %v147_v30 }
 0x342   :  { %151 = vrot.lane.b32.xlu1 %v149_v31, %s2656_s16 }
 0x3b4   :  { %v152_v33 = vpop.permute.xlu1 %151 }
 0x3b5   :  { %v154_v34 = vadd.f32 %v152_v33, %v144_v32 }
 0x3b7   :  { %2505 = vtanh.f32 %v154_v34 }
 0x3c1   :  { %v2506_v35 = vpop.eup %2505 }
 0x3c2   :  { %157 = vrot.lane.b32.xlu0 %v2506_v35, %s2655_s15 }
 0x434   :  { %v158_v36 = vpop.permute.xlu0 %157 }
 0x435   :  { %v2768_v37 = vmul.f32 %v2504_v29, %v158_v36 }
 0x437   :  { %v166_v38 = vpack.c.bf16 %v2768_v37, %v2768_v37 }
 0x439   :  { %168 = vrot.lane.b32.xlu1 %v166_v38, %s2656_s16 }
 0x4ab   :  { %v169_v39 = vpop.permute.xlu1 %168 }
 0x4ac   :  { %2237 = vmatmul.mubr.msk.bf16.vlgmr.msra.gmra.mrb[0].mxu1 %vm93_vm1, %v169_v39 }
 0x4ad   :  { %2249 = vmatpush3.bf16.msra.mxu1 %v2725_v11  ;;  %2252 = vmatprep.mubr.msk.bf16.mxu1 %vm2658_vm0, %v2657_v12 }
 0x4ae   :  { %2250 = vmatprep.subr.bf16.mxu1 %v2657_v12 }
 0x4b1   :  { %2251 = vmatpush3.bf16.msra.mxu1 %v2734_v13 }
 0x4b2   :  { %2264 = vmatprep.subr.bf16.mxu1 %v2657_v12 }
 0x57f   :  { %v207_v40 = vpop.f32.mrb[0].mxu1 }
 0x580   :  { %v208_v41 = vadd.f32 %v207_v40, %v2762_v19  ;;  %v2238_v42 = vpop.f32.mrb[1].mxu1 }
 0x581   :  { %v210_v43 = vpop.f32.mrb[2].mxu1 }
 0x582   :  { %2507 = vtanh.f32 %v208_v41  ;;  %v2239_v44 = vpop.f32.mrb[3].mxu1  ;;  %v2024_v46 = vmul.f32 -1.442695, %v208_v41 }
 0x584   :  { %2509 = vpow2.f32 %v2024_v46 }
 0x58c   :  { %v2508_v45 = vpop.eup %2507 }
 0x58d   :  { %222 = vrot.lane.b32.xlu0 %v2508_v45, %s2655_s15 }
 0x58e   :  { %v2510_v47 = vpop.eup %2509 }
 0x58f   :  { %v216_v48 = vadd.f32 1.0, %v2510_v47 }
 0x591   :  { %2511 = vrcp.f32 %v216_v48 }
 0x59b   :  { %v2512_v49 = vpop.eup %2511 }
 0x59c   :  { %v220_v52 = vmul.f32 %v2512_v49, %v154_v34 }
 0x5ff   :  { %v223_v50 = vpop.permute.xlu0 %222 }
 0x600   :  { %v225_v51 = vmul.f32 %v2512_v49, %v223_v50 }
 0x602   :  { %227 = vrot.lane.b32.xlu1 %v225_v51, %s2656_s16 }
 0x674   :  { %v228_v53 = vpop.permute.xlu1 %227 }
 0x675   :  { %v230_v54 = vadd.f32 %v228_v53, %v220_v52 }
 0x677   :  { %2513 = vtanh.f32 %v230_v54 }
 0x681   :  { %v2514_v55 = vpop.eup %2513 }
 0x682   :  { %233 = vrot.lane.b32.xlu0 %v2514_v55, %s2655_s15 }
 0x6f4   :  { %v234_v56 = vpop.permute.xlu0 %233 }
 0x6f5   :  { %v2784_v57 = vmul.f32 %v2512_v49, %v234_v56 }
 0x6f7   :  { %v242_v58 = vpack.c.bf16 %v2784_v57, %v2784_v57 }
 0x6f9   :  { %244 = vrot.lane.b32.xlu1 %v242_v58, %s2656_s16 }
 0x76b   :  { %v245_v59 = vpop.permute.xlu1 %244 }
 0x76c   :  { %2245 = vmatmul.mubr.msk.bf16.vlgmr.msra.gmra.mrb[4].mxu0 %vm93_vm1, %v245_v59 }
 0x76d   :  { %2257 = vmatpush3.bf16.msra.mxu0 %v2725_v11  ;;  %2260 = vmatprep.mubr.msk.bf16.mxu0 %vm2658_vm0, %v2657_v12 }
 0x76e   :  { %2258 = vmatprep.subr.bf16.mxu0 %v2657_v12 }
 0x771   :  { %2259 = vmatpush3.bf16.msra.mxu0 %v2734_v13 }
 0x772   :  { %2272 = vmatprep.subr.bf16.mxu0 %v2657_v12 }
 0x83f   :  { %v283_v60 = vpop.f32.mrb[4].mxu0 }
 0x840   :  { %v284_v61 = vadd.f32 %v283_v60, %v2762_v19  ;;  %v2246_v62 = vpop.f32.mrb[5].mxu0 }
 0x841   :  { %v286_v63 = vpop.f32.mrb[6].mxu0 }
 0x842   :  { %2515 = vtanh.f32 %v284_v61  ;;  %v2247_v0 = vpop.f32.mrb[7].mxu0  ;;  %v2026_v2 = vmul.f32 -1.442695, %v284_v61 }
 0x844   :  { %2517 = vpow2.f32 %v2026_v2 }
 0x84c   :  { %v2516_v1 = vpop.eup %2515 }
 0x84d   :  { %298 = vrot.lane.b32.xlu0 %v2516_v1, %s2655_s15 }
 0x84e   :  { %v2518_v3 = vpop.eup %2517 }
 0x84f   :  { %v292_v4 = vadd.f32 1.0, %v2518_v3 }
 0x851   :  { %2519 = vrcp.f32 %v292_v4 }
 0x85b   :  { %v2520_v5 = vpop.eup %2519 }
 0x85c   :  { %v296_v8 = vmul.f32 %v2520_v5, %v230_v54 }
 0x8bf   :  { %v299_v6 = vpop.permute.xlu0 %298 }
 0x8c0   :  { %v301_v7 = vmul.f32 %v2520_v5, %v299_v6 }
 0x8c2   :  { %303 = vrot.lane.b32.xlu1 %v301_v7, %s2656_s16 }
 0x934   :  { %v304_v9 = vpop.permute.xlu1 %303 }
 0x935   :  { %v306_v10 = vadd.f32 %v304_v9, %v296_v8 }
 0x937   :  { %2521 = vtanh.f32 %v306_v10 }
 0x941   :  { %v2522_v14 = vpop.eup %2521 }
 0x942   :  { %309 = vrot.lane.b32.xlu0 %v2522_v14, %s2655_s15 }
 0x9b4   :  { %v310_v15 = vpop.permute.xlu0 %309 }
 0x9b5   :  { %v2800_v17 = vmul.f32 %v2520_v5, %v310_v15 }
 0x9b7   :  { %v318_v18 = vpack.c.bf16 %v2800_v17, %v2800_v17 }
 0x9b9   :  { %320 = vrot.lane.b32.xlu1 %v318_v18, %s2656_s16 }
 0xa2b   :  { %v321_v20 = vpop.permute.xlu1 %320 }
 0xa2c   :  { %2253 = vmatmul.mubr.msk.bf16.vlgmr.msra.gmra.mrb[4].mxu1 %vm93_vm1, %v321_v20 }
 0xa2d   :  { %2265 = vmatpush3.bf16.msra.mxu1 %v2725_v11  ;;  %2268 = vmatprep.mubr.msk.bf16.mxu1 %vm2658_vm0, %v2657_v12 }
 0xa2e   :  { %2266 = vmatprep.subr.bf16.mxu1 %v2657_v12 }
 0xa31   :  { %2267 = vmatpush3.bf16.msra.mxu1 %v2734_v13 }
 0xa32   :  { %2280 = vmatprep.subr.bf16.mxu1 %v2657_v12 }
 0xaff   :  { %v359_v21 = vpop.f32.mrb[4].mxu1 }
 0xb00   :  { %v360_v22 = vadd.f32 %v359_v21, %v2762_v19  ;;  %v2254_v23 = vpop.f32.mrb[5].mxu1 }
 0xb01   :  { %v362_v24 = vpop.f32.mrb[6].mxu1 }
 0xb02   :  { %2523 = vtanh.f32 %v360_v22  ;;  %v2255_v25 = vpop.f32.mrb[7].mxu1  ;;  %v2028_v27 = vmul.f32 -1.442695, %v360_v22 }
 0xb04   :  { %2525 = vpow2.f32 %v2028_v27 }
 0xb0c   :  { %v2524_v26 = vpop.eup %2523 }
 0xb0d   :  { %374 = vrot.lane.b32.xlu0 %v2524_v26, %s2655_s15 }
 0xb0e   :  { %v2526_v28 = vpop.eup %2525 }
 0xb0f   :  { %v368_v29 = vadd.f32 1.0, %v2526_v28 }
 0xb11   :  { %2527 = vrcp.f32 %v368_v29 }
 0xb1b   :  { %v2528_v30 = vpop.eup %2527 }
 0xb1c   :  { %v372_v33 = vmul.f32 %v2528_v30, %v306_v10 }
 0xb7f   :  { %v375_v31 = vpop.permute.xlu0 %374 }
 0xb80   :  { %v377_v32 = vmul.f32 %v2528_v30, %v375_v31 }
 0xb82   :  { %379 = vrot.lane.b32.xlu1 %v377_v32, %s2656_s16 }
 0xbf4   :  { %v380_v34 = vpop.permute.xlu1 %379 }
 0xbf5   :  { %v382_v35 = vadd.f32 %v380_v34, %v372_v33 }
 0xbf7   :  { %2529 = vtanh.f32 %v382_v35 }
 0xc01   :  { %v2530_v36 = vpop.eup %2529 }
 0xc02   :  { %385 = vrot.lane.b32.xlu0 %v2530_v36, %s2655_s15 }
 0xc74   :  { %v386_v38 = vpop.permute.xlu0 %385 }
 0xc75   :  { %v2816_v39 = vmul.f32 %v2528_v30, %v386_v38 }
 0xc77   :  { %v394_v40 = vpack.c.bf16 %v2816_v39, %v2816_v39 }
 0xc79   :  { %396 = vrot.lane.b32.xlu1 %v394_v40, %s2656_s16 }
 0xceb   :  { %v397_v41 = vpop.permute.xlu1 %396 }
 0xcec   :  { %2261 = vmatmul.mubr.msk.bf16.vlgmr.msra.gmra.mrb[8].mxu0 %vm93_vm1, %v397_v41 }
 0xced   :  { %2273 = vmatpush3.bf16.msra.mxu0 %v2725_v11  ;;  %2276 = vmatprep.mubr.msk.bf16.mxu0 %vm2658_vm0, %v2657_v12 }
 0xcee   :  { %2274 = vmatprep.subr.bf16.mxu0 %v2657_v12 }
 0xcf1   :  { %2275 = vmatpush3.bf16.msra.mxu0 %v2734_v13 }
 0xcf2   :  { %2288 = vmatprep.subr.bf16.mxu0 %v2657_v12 }
 0xdbf   :  { %v435_v42 = vpop.f32.mrb[8].mxu0 }
 0xdc0   :  { %v436_v43 = vadd.f32 %v435_v42, %v2762_v19  ;;  %v2262_v44 = vpop.f32.mrb[9].mxu0 }
 0xdc1   :  { %v438_v45 = vpop.f32.mrb[10].mxu0 }
 0xdc2   :  { %2531 = vtanh.f32 %v436_v43  ;;  %v2263_v46 = vpop.f32.mrb[11].mxu0  ;;  %v2030_v48 = vmul.f32 -1.442695, %v436_v43 }
 0xdc4   :  { %2533 = vpow2.f32 %v2030_v48 }
 0xdcc   :  { %v2532_v47 = vpop.eup %2531 }
 0xdcd   :  { %450 = vrot.lane.b32.xlu0 %v2532_v47, %s2655_s15 }
 0xdce   :  { %v2534_v49 = vpop.eup %2533 }
 0xdcf   :  { %v444_v50 = vadd.f32 1.0, %v2534_v49 }
 0xdd1   :  { %2535 = vrcp.f32 %v444_v50 }
 0xddb   :  { %v2536_v51 = vpop.eup %2535 }
 0xddc   :  { %v448_v54 = vmul.f32 %v2536_v51, %v382_v35 }
 0xe3f   :  { %v451_v52 = vpop.permute.xlu0 %450 }
 0xe40   :  { %v453_v53 = vmul.f32 %v2536_v51, %v451_v52 }
 0xe42   :  { %455 = vrot.lane.b32.xlu1 %v453_v53, %s2656_s16 }
 0xeb4   :  { %v456_v55 = vpop.permute.xlu1 %455 }
 0xeb5   :  { %v458_v56 = vadd.f32 %v456_v55, %v448_v54 }
 0xeb7   :  { %2537 = vtanh.f32 %v458_v56 }
 0xec1   :  { %v2538_v58 = vpop.eup %2537 }
 0xec2   :  { %461 = vrot.lane.b32.xlu0 %v2538_v58, %s2655_s15 }
 0xf34   :  { %v462_v59 = vpop.permute.xlu0 %461 }
 0xf35   :  { %v2832_v60 = vmul.f32 %v2536_v51, %v462_v59 }
 0xf37   :  { %v470_v61 = vpack.c.bf16 %v2832_v60, %v2832_v60 }
 0xf39   :  { %472 = vrot.lane.b32.xlu1 %v470_v61, %s2656_s16 }
 0xfab   :  { %v473_v62 = vpop.permute.xlu1 %472 }
 0xfac   :  { %2269 = vmatmul.mubr.msk.bf16.vlgmr.msra.gmra.mrb[8].mxu1 %vm93_vm1, %v473_v62 }
 0xfad   :  { %2281 = vmatpush3.bf16.msra.mxu1 %v2725_v11  ;;  %2284 = vmatprep.mubr.msk.bf16.mxu1 %vm2658_vm0, %v2657_v12 }
 0xfae   :  { %2282 = vmatprep.subr.bf16.mxu1 %v2657_v12 }
 0xfb1   :  { %2283 = vmatpush3.bf16.msra.mxu1 %v2734_v13 }
 0xfb2   :  { %2296 = vmatprep.subr.bf16.mxu1 %v2657_v12 }
0x107f   :  { %v511_v63 = vpop.f32.mrb[8].mxu1 }
0x1080   :  { %v512_v0 = vadd.f32 %v511_v63, %v2762_v19  ;;  %v2270_v1 = vpop.f32.mrb[9].mxu1 }
0x1081   :  { %v514_v2 = vpop.f32.mrb[10].mxu1 }
0x1082   :  { %2539 = vtanh.f32 %v512_v0  ;;  %v2271_v3 = vpop.f32.mrb[11].mxu1  ;;  %v2032_v5 = vmul.f32 -1.442695, %v512_v0 }
0x1084   :  { %2541 = vpow2.f32 %v2032_v5 }
0x108c   :  { %v2540_v4 = vpop.eup %2539 }
0x108d   :  { %526 = vrot.lane.b32.xlu0 %v2540_v4, %s2655_s15 }
0x108e   :  { %v2542_v6 = vpop.eup %2541 }
0x108f   :  { %v520_v7 = vadd.f32 1.0, %v2542_v6 }
0x1091   :  { %2543 = vrcp.f32 %v520_v7 }
0x109b   :  { %v2544_v8 = vpop.eup %2543 }
0x109c   :  { %v524_v14 = vmul.f32 %v2544_v8, %v458_v56 }
0x10ff   :  { %v527_v9 = vpop.permute.xlu0 %526 }
0x1100   :  { %v529_v10 = vmul.f32 %v2544_v8, %v527_v9 }
0x1102   :  { %531 = vrot.lane.b32.xlu1 %v529_v10, %s2656_s16 }
0x1174   :  { %v532_v15 = vpop.permute.xlu1 %531 }
0x1175   :  { %v534_v18 = vadd.f32 %v532_v15, %v524_v14 }
0x1177   :  { %2545 = vtanh.f32 %v534_v18 }
0x1181   :  { %v2546_v20 = vpop.eup %2545 }
0x1182   :  { %537 = vrot.lane.b32.xlu0 %v2546_v20, %s2655_s15 }
0x11f4   :  { %v538_v21 = vpop.permute.xlu0 %537 }
0x11f5   :  { %v2848_v22 = vmul.f32 %v2544_v8, %v538_v21 }
0x11f7   :  { %v546_v23 = vpack.c.bf16 %v2848_v22, %v2848_v22 }
0x11f9   :  { %548 = vrot.lane.b32.xlu1 %v546_v23, %s2656_s16 }
0x126b   :  { %v549_v24 = vpop.permute.xlu1 %548 }
0x126c   :  { %2277 = vmatmul.mubr.msk.bf16.vlgmr.msra.gmra.mrb[12].mxu0 %vm93_vm1, %v549_v24 }
0x126d   :  { %2289 = vmatpush3.bf16.msra.mxu0 %v2725_v11  ;;  %2292 = vmatprep.mubr.msk.bf16.mxu0 %vm2658_vm0, %v2657_v12 }
0x126e   :  { %2290 = vmatprep.subr.bf16.mxu0 %v2657_v12 }
0x1271   :  { %2291 = vmatpush3.bf16.msra.mxu0 %v2734_v13 }
0x1272   :  { %2304 = vmatprep.subr.bf16.mxu0 %v2657_v12 }
0x133f   :  { %v587_v25 = vpop.f32.mrb[12].mxu0 }
0x1340   :  { %v588_v26 = vadd.f32 %v587_v25, %v2762_v19  ;;  %v2278_v27 = vpop.f32.mrb[13].mxu0 }
0x1341   :  { %v590_v28 = vpop.f32.mrb[14].mxu0 }
0x1342   :  { %2547 = vtanh.f32 %v588_v26  ;;  %v2279_v29 = vpop.f32.mrb[15].mxu0  ;;  %v2034_v31 = vmul.f32 -1.442695, %v588_v26 }
0x1344   :  { %2549 = vpow2.f32 %v2034_v31 }
0x134c   :  { %v2548_v30 = vpop.eup %2547 }
0x134d   :  { %602 = vrot.lane.b32.xlu0 %v2548_v30, %s2655_s15 }
0x134e   :  { %v2550_v32 = vpop.eup %2549 }
0x134f   :  { %v596_v33 = vadd.f32 1.0, %v2550_v32 }
0x1351   :  { %2551 = vrcp.f32 %v596_v33 }
0x135b   :  { %v2552_v34 = vpop.eup %2551 }
0x135c   :  { %v600_v38 = vmul.f32 %v2552_v34, %v534_v18 }
0x13bf   :  { %v603_v35 = vpop.permute.xlu0 %602 }
0x13c0   :  { %v605_v36 = vmul.f32 %v2552_v34, %v603_v35 }
0x13c2   :  { %607 = vrot.lane.b32.xlu1 %v605_v36, %s2656_s16 }
0x1434   :  { %v608_v40 = vpop.permute.xlu1 %607 }
0x1435   :  { %v610_v41 = vadd.f32 %v608_v40, %v600_v38 }
0x1437   :  { %2553 = vtanh.f32 %v610_v41 }
0x1441   :  { %v2554_v42 = vpop.eup %2553 }
0x1442   :  { %613 = vrot.lane.b32.xlu0 %v2554_v42, %s2655_s15 }
0x14b4   :  { %v614_v43 = vpop.permute.xlu0 %613 }
0x14b5   :  { %v2864_v44 = vmul.f32 %v2552_v34, %v614_v43 }
0x14b7   :  { %v622_v45 = vpack.c.bf16 %v2864_v44, %v2864_v44 }
0x14b9   :  { %624 = vrot.lane.b32.xlu1 %v622_v45, %s2656_s16 }
0x152b   :  { %v625_v46 = vpop.permute.xlu1 %624 }
0x152c   :  { %2285 = vmatmul.mubr.msk.bf16.vlgmr.msra.gmra.mrb[12].mxu1 %vm93_vm1, %v625_v46 }
0x152d   :  { %2297 = vmatpush3.bf16.msra.mxu1 %v2725_v11  ;;  %2300 = vmatprep.mubr.msk.bf16.mxu1 %vm2658_vm0, %v2657_v12 }
0x152e   :  { %2298 = vmatprep.subr.bf16.mxu1 %v2657_v12 }
0x1531   :  { %2299 = vmatpush3.bf16.msra.mxu1 %v2734_v13 }
0x1532   :  { %2312 = vmatprep.subr.bf16.mxu1 %v2657_v12 }
0x15ff   :  { %v663_v47 = vpop.f32.mrb[12].mxu1 }
0x1600   :  { %v664_v48 = vadd.f32 %v663_v47, %v2762_v19  ;;  %v2286_v49 = vpop.f32.mrb[13].mxu1 }
0x1601   :  { %v666_v50 = vpop.f32.mrb[14].mxu1 }
0x1602   :  { %2555 = vtanh.f32 %v664_v48  ;;  %v2287_v51 = vpop.f32.mrb[15].mxu1  ;;  %v2036_v53 = vmul.f32 -1.442695, %v664_v48 }
0x1604   :  { %2557 = vpow2.f32 %v2036_v53 }
0x160c   :  { %v2556_v52 = vpop.eup %2555 }
0x160d   :  { %678 = vrot.lane.b32.xlu0 %v2556_v52, %s2655_s15 }
0x160e   :  { %v2558_v54 = vpop.eup %2557 }
0x160f   :  { %v672_v55 = vadd.f32 1.0, %v2558_v54 }
0x1611   :  { %2559 = vrcp.f32 %v672_v55 }
0x161b   :  { %v2560_v56 = vpop.eup %2559 }
0x161c   :  { %v676_v61 = vmul.f32 %v2560_v56, %v610_v41 }
0x167f   :  { %v679_v58 = vpop.permute.xlu0 %678 }
0x1680   :  { %v681_v59 = vmul.f32 %v2560_v56, %v679_v58 }
0x1682   :  { %683 = vrot.lane.b32.xlu1 %v681_v59, %s2656_s16 }
0x16f4   :  { %v684_v62 = vpop.permute.xlu1 %683 }
0x16f5   :  { %v686_v63 = vadd.f32 %v684_v62, %v676_v61 }
0x16f7   :  { %2561 = vtanh.f32 %v686_v63 }
0x1701   :  { %v2562_v0 = vpop.eup %2561 }
0x1702   :  { %689 = vrot.lane.b32.xlu0 %v2562_v0, %s2655_s15 }
0x1774   :  { %v690_v1 = vpop.permute.xlu0 %689 }
0x1775   :  { %v2880_v2 = vmul.f32 %v2560_v56, %v690_v1 }
0x1777   :  { %v699_v3 = vpack.c.bf16 %v2880_v2, %v2880_v2 }
0x1779   :  { %701 = vrot.lane.b32.xlu1 %v699_v3, %s2656_s16 }
0x17eb   :  { %v702_v4 = vpop.permute.xlu1 %701 }
0x17ec   :  { %2293 = vmatmul.mubr.msk.bf16.vlgmr.msra.gmra.mrb[16].mxu0 %vm93_vm1, %v702_v4 }
0x17ed   :  { %2305 = vmatpush3.bf16.msra.mxu0 %v2725_v11  ;;  %2308 = vmatprep.mubr.msk.bf16.mxu0 %vm2658_vm0, %v2657_v12 }
0x17ee   :  { %2306 = vmatprep.subr.bf16.mxu0 %v2657_v12 }
0x17f1   :  { %2307 = vmatpush3.bf16.msra.mxu0 %v2734_v13 }
0x17f2   :  { %2320 = vmatprep.subr.bf16.mxu0 %v2657_v12 }
0x18bf   :  { %v740_v5 = vpop.f32.mrb[16].mxu0 }
0x18c0   :  { %v741_v6 = vadd.f32 %v740_v5, %v2762_v19  ;;  %v2294_v7 = vpop.f32.mrb[17].mxu0 }
0x18c1   :  { %v743_v8 = vpop.f32.mrb[18].mxu0 }
0x18c2   :  { %2563 = vtanh.f32 %v741_v6  ;;  %v2295_v9 = vpop.f32.mrb[19].mxu0  ;;  %v2038_v14 = vmul.f32 -1.442695, %v741_v6 }
0x18c4   :  { %2565 = vpow2.f32 %v2038_v14 }
0x18cc   :  { %v2564_v10 = vpop.eup %2563 }
0x18cd   :  { %755 = vrot.lane.b32.xlu0 %v2564_v10, %s2655_s15 }
0x18ce   :  { %v2566_v15 = vpop.eup %2565 }
0x18cf   :  { %v749_v18 = vadd.f32 1.0, %v2566_v15 }
0x18d1   :  { %2567 = vrcp.f32 %v749_v18 }
0x18db   :  { %v2568_v20 = vpop.eup %2567 }
0x18dc   :  { %v753_v24 = vmul.f32 %v2568_v20, %v686_v63 }
0x193f   :  { %v756_v21 = vpop.permute.xlu0 %755 }
0x1940   :  { %v758_v23 = vmul.f32 %v2568_v20, %v756_v21 }
0x1942   :  { %760 = vrot.lane.b32.xlu1 %v758_v23, %s2656_s16 }
0x19b4   :  { %v761_v25 = vpop.permute.xlu1 %760 }
0x19b5   :  { %v763_v26 = vadd.f32 %v761_v25, %v753_v24 }
0x19b7   :  { %2569 = vtanh.f32 %v763_v26 }
0x19c1   :  { %v2570_v27 = vpop.eup %2569 }
0x19c2   :  { %766 = vrot.lane.b32.xlu0 %v2570_v27, %s2655_s15 }
0x1a34   :  { %v767_v28 = vpop.permute.xlu0 %766 }
0x1a35   :  { %v2896_v29 = vmul.f32 %v2568_v20, %v767_v28 }
0x1a37   :  { %v775_v30 = vpack.c.bf16 %v2896_v29, %v2896_v29 }
0x1a39   :  { %777 = vrot.lane.b32.xlu1 %v775_v30, %s2656_s16 }
0x1aab   :  { %v778_v31 = vpop.permute.xlu1 %777 }
0x1aac   :  { %2301 = vmatmul.mubr.msk.bf16.vlgmr.msra.gmra.mrb[16].mxu1 %vm93_vm1, %v778_v31 }
0x1aad   :  { %2313 = vmatpush3.bf16.msra.mxu1 %v2725_v11  ;;  %2316 = vmatprep.mubr.msk.bf16.mxu1 %vm2658_vm0, %v2657_v12 }
0x1aae   :  { %2314 = vmatprep.subr.bf16.mxu1 %v2657_v12 }
0x1ab1   :  { %2315 = vmatpush3.bf16.msra.mxu1 %v2734_v13 }
0x1ab2   :  { %2328 = vmatprep.subr.bf16.mxu1 %v2657_v12 }
0x1b7f   :  { %v816_v32 = vpop.f32.mrb[16].mxu1 }
0x1b80   :  { %v817_v33 = vadd.f32 %v816_v32, %v2762_v19  ;;  %v2302_v34 = vpop.f32.mrb[17].mxu1 }
0x1b81   :  { %v819_v35 = vpop.f32.mrb[18].mxu1 }
0x1b82   :  { %2571 = vtanh.f32 %v817_v33  ;;  %v2303_v36 = vpop.f32.mrb[19].mxu1  ;;  %v2040_v40 = vmul.f32 -1.442695, %v817_v33 }
0x1b84   :  { %2573 = vpow2.f32 %v2040_v40 }
0x1b8c   :  { %v2572_v38 = vpop.eup %2571 }
0x1b8d   :  { %831 = vrot.lane.b32.xlu0 %v2572_v38, %s2655_s15 }
0x1b8e   :  { %v2574_v41 = vpop.eup %2573 }
0x1b8f   :  { %v825_v42 = vadd.f32 1.0, %v2574_v41 }
0x1b91   :  { %2575 = vrcp.f32 %v825_v42 }
0x1b9b   :  { %v2576_v43 = vpop.eup %2575 }
0x1b9c   :  { %v829_v47 = vmul.f32 %v2576_v43, %v763_v26 }
0x1bff   :  { %v832_v45 = vpop.permute.xlu0 %831 }
0x1c00   :  { %v834_v46 = vmul.f32 %v2576_v43, %v832_v45 }
0x1c02   :  { %836 = vrot.lane.b32.xlu1 %v834_v46, %s2656_s16 }
0x1c74   :  { %v837_v48 = vpop.permute.xlu1 %836 }
0x1c75   :  { %v839_v49 = vadd.f32 %v837_v48, %v829_v47 }
0x1c77   :  { %2577 = vtanh.f32 %v839_v49 }
0x1c81   :  { %v2578_v50 = vpop.eup %2577 }
0x1c82   :  { %842 = vrot.lane.b32.xlu0 %v2578_v50, %s2655_s15 }
0x1cf4   :  { %v843_v51 = vpop.permute.xlu0 %842 }
0x1cf5   :  { %v2912_v52 = vmul.f32 %v2576_v43, %v843_v51 }
0x1cf7   :  { %v851_v53 = vpack.c.bf16 %v2912_v52, %v2912_v52 }
0x1cf9   :  { %853 = vrot.lane.b32.xlu1 %v851_v53, %s2656_s16 }
0x1d6b   :  { %v854_v54 = vpop.permute.xlu1 %853 }
0x1d6c   :  { %2309 = vmatmul.mubr.msk.bf16.vlgmr.msra.gmra.mrb[20].mxu0 %vm93_vm1, %v854_v54 }
0x1d6d   :  { %2321 = vmatpush3.bf16.msra.mxu0 %v2725_v11  ;;  %2324 = vmatprep.mubr.msk.bf16.mxu0 %vm2658_vm0, %v2657_v12 }
0x1d6e   :  { %2322 = vmatprep.subr.bf16.mxu0 %v2657_v12 }
0x1d71   :  { %2323 = vmatpush3.bf16.msra.mxu0 %v2734_v13 }
0x1d72   :  { %2336 = vmatprep.subr.bf16.mxu0 %v2657_v12 }
0x1e3f   :  { %v892_v55 = vpop.f32.mrb[20].mxu0 }
0x1e40   :  { %v893_v56 = vadd.f32 %v892_v55, %v2762_v19  ;;  %v2310_v58 = vpop.f32.mrb[21].mxu0 }
0x1e41   :  { %v895_v59 = vpop.f32.mrb[22].mxu0 }
0x1e42   :  { %2579 = vtanh.f32 %v893_v56  ;;  %v2311_v61 = vpop.f32.mrb[23].mxu0  ;;  %v2042_v63 = vmul.f32 -1.442695, %v893_v56 }
0x1e44   :  { %2581 = vpow2.f32 %v2042_v63 }
0x1e4c   :  { %v2580_v62 = vpop.eup %2579 }
0x1e4d   :  { %907 = vrot.lane.b32.xlu0 %v2580_v62, %s2655_s15 }
0x1e4e   :  { %v2582_v0 = vpop.eup %2581 }
0x1e4f   :  { %v901_v1 = vadd.f32 1.0, %v2582_v0 }
0x1e51   :  { %2583 = vrcp.f32 %v901_v1 }
0x1e5b   :  { %v2584_v3 = vpop.eup %2583 }
0x1e5c   :  { %v905_v6 = vmul.f32 %v2584_v3, %v839_v49 }
0x1ebf   :  { %v908_v4 = vpop.permute.xlu0 %907 }
0x1ec0   :  { %v910_v5 = vmul.f32 %v2584_v3, %v908_v4 }
0x1ec2   :  { %912 = vrot.lane.b32.xlu1 %v910_v5, %s2656_s16 }
0x1f34   :  { %v913_v7 = vpop.permute.xlu1 %912 }
0x1f35   :  { %v915_v8 = vadd.f32 %v913_v7, %v905_v6 }
0x1f37   :  { %2585 = vtanh.f32 %v915_v8 }
0x1f41   :  { %v2586_v9 = vpop.eup %2585 }
0x1f42   :  { %918 = vrot.lane.b32.xlu0 %v2586_v9, %s2655_s15 }
0x1fb4   :  { %v919_v10 = vpop.permute.xlu0 %918 }
0x1fb5   :  { %v2928_v14 = vmul.f32 %v2584_v3, %v919_v10 }
0x1fb7   :  { %v927_v15 = vpack.c.bf16 %v2928_v14, %v2928_v14 }
0x1fb9   :  { %929 = vrot.lane.b32.xlu1 %v927_v15, %s2656_s16 }
0x202b   :  { %v930_v18 = vpop.permute.xlu1 %929 }
0x202c   :  { %2317 = vmatmul.mubr.msk.bf16.vlgmr.msra.gmra.mrb[20].mxu1 %vm93_vm1, %v930_v18 }
0x202d   :  { %2329 = vmatpush3.bf16.msra.mxu1 %v2725_v11  ;;  %2332 = vmatprep.mubr.msk.bf16.mxu1 %vm2658_vm0, %v2657_v12 }
0x202e   :  { %2330 = vmatprep.subr.bf16.mxu1 %v2657_v12 }
0x2031   :  { %2331 = vmatpush3.bf16.msra.mxu1 %v2734_v13 }
0x2032   :  { %2344 = vmatprep.subr.bf16.mxu1 %v2657_v12 }
0x20ff   :  { %v968_v20 = vpop.f32.mrb[20].mxu1 }
0x2100   :  { %v969_v21 = vadd.f32 %v968_v20, %v2762_v19  ;;  %v2318_v23 = vpop.f32.mrb[21].mxu1 }
0x2101   :  { %v971_v24 = vpop.f32.mrb[22].mxu1 }
0x2102   :  { %2587 = vtanh.f32 %v969_v21  ;;  %v2319_v25 = vpop.f32.mrb[23].mxu1  ;;  %v2044_v27 = vmul.f32 -1.442695, %v969_v21 }
0x2104   :  { %2589 = vpow2.f32 %v2044_v27 }
0x210c   :  { %v2588_v26 = vpop.eup %2587 }
0x210d   :  { %983 = vrot.lane.b32.xlu0 %v2588_v26, %s2655_s15 }
0x210e   :  { %v2590_v28 = vpop.eup %2589 }
0x210f   :  { %v977_v30 = vadd.f32 1.0, %v2590_v28 }
0x2111   :  { %2591 = vrcp.f32 %v977_v30 }
0x211b   :  { %v2592_v31 = vpop.eup %2591 }
0x211c   :  { %v981_v34 = vmul.f32 %v2592_v31, %v915_v8 }
0x217f   :  { %v984_v32 = vpop.permute.xlu0 %983 }
0x2180   :  { %v986_v33 = vmul.f32 %v2592_v31, %v984_v32 }
0x2182   :  { %988 = vrot.lane.b32.xlu1 %v986_v33, %s2656_s16 }
0x21f4   :  { %v989_v35 = vpop.permute.xlu1 %988 }
0x21f5   :  { %v991_v36 = vadd.f32 %v989_v35, %v981_v34 }
0x21f7   :  { %2593 = vtanh.f32 %v991_v36 }
0x2201   :  { %v2594_v38 = vpop.eup %2593 }
0x2202   :  { %994 = vrot.lane.b32.xlu0 %v2594_v38, %s2655_s15 }
0x2274   :  { %v995_v40 = vpop.permute.xlu0 %994 }
0x2275   :  { %v2944_v41 = vmul.f32 %v2592_v31, %v995_v40 }
0x2277   :  { %v1003_v42 = vpack.c.bf16 %v2944_v41, %v2944_v41 }
0x2279   :  { %1005 = vrot.lane.b32.xlu1 %v1003_v42, %s2656_s16 }
0x22eb   :  { %v1006_v43 = vpop.permute.xlu1 %1005 }
0x22ec   :  { %2325 = vmatmul.mubr.msk.bf16.vlgmr.msra.gmra.mrb[24].mxu0 %vm93_vm1, %v1006_v43 }
0x22ed   :  { %2337 = vmatpush3.bf16.msra.mxu0 %v2725_v11  ;;  %2340 = vmatprep.mubr.msk.bf16.mxu0 %vm2658_vm0, %v2657_v12 }
0x22ee   :  { %2338 = vmatprep.subr.bf16.mxu0 %v2657_v12 }
0x22f1   :  { %2339 = vmatpush3.bf16.msra.mxu0 %v2734_v13 }
0x22f2   :  { %2356 = vmatprep.subr.bf16.mxu0 %v2657_v12 }
0x23bf   :  { %v1044_v45 = vpop.f32.mrb[24].mxu0 }
0x23c0   :  { %v1045_v46 = vadd.f32 %v1044_v45, %v2762_v19  ;;  %v2326_v47 = vpop.f32.mrb[25].mxu0  ;;  %v68_v45 = vlaneseq }
0x23c1   :  { %v1047_v48 = vpop.f32.mrb[26].mxu0 }
0x23c2   :  { %2595 = vtanh.f32 %v1045_v46  ;;  %v2327_v49 = vpop.f32.mrb[27].mxu0  ;;  %v2046_v11 = vmul.f32 -1.442695, %v1045_v46  ;;  %v69_v46 = vshrl.u32 %v68_v45, 7 }
0x23c4   :  { %2597 = vpow2.f32 %v2046_v11  ;;  %v70_v49 = vsub.s32 0, %v69_v46  ;;  %v2485_v46 = vld [vmem:[%s3241_s7 + $0x48] sm:$0xff]  }
0x23cc   :  { %v2596_v50 = vpop.eup %2595 }
0x23cd   :  { %1059 = vrot.lane.b32.xlu0 %v2596_v50, %s2655_s15  ;;  %v71_v50 = vrot.slane %v2747_v16, %v70_v49  ;;  %v2488_v49 = vld [vmem:[%s3241_s7 + $0x70] sm:$0xff]  }
0x23ce   :  { %v2598_v51 = vpop.eup %2597 }
0x23cf   :  { %v1053_v53 = vadd.f32 1.0, %v2598_v51 }
0x23d1   :  { %2599 = vrcp.f32 %v1053_v53  ;;  %v2461_v53 = vld [vmem:[%s3239_s5 + $0x8] sm:$0xff]  }
0x23db   :  { %v2600_v54 = vpop.eup %2599 }
0x23dc   :  { %v1057_v56 = vmul.f32 %v2600_v54, %v991_v36 }
0x243f   :  { %v1060_v55 = vpop.permute.xlu0 %1059 }
0x2440   :  { %v1062_v13 = vmul.f32 %v2600_v54, %v1060_v55 }
0x2442   :  { %1064 = vrot.lane.b32.xlu1 %v1062_v13, %s2656_s16  ;;  %v2463_v13 = vld [vmem:[%s3239_s5 + $0x10] sm:$0xff]  }
0x24b4   :  { %v1065_v58 = vpop.permute.xlu1 %1064 }
0x24b5   :  { %v1067_v59 = vadd.f32 %v1065_v58, %v1057_v56  ;;  %v2464_v56 = vld [vmem:[%s3239_s5 + $0x30] sm:$0xff]  }
0x24b7   :  { %2601 = vtanh.f32 %v1067_v59 }
0x24c1   :  { %v2602_v61 = vpop.eup %2601 }
0x24c2   :  { %1070 = vrot.lane.b32.xlu0 %v2602_v61, %s2655_s15 }
0x2534   :  { %v1071_v62 = vpop.permute.xlu0 %1070 }
0x2535   :  { %v2960_v63 = vmul.f32 %v2600_v54, %v1071_v62  ;;  %v2462_v54 = vld [vmem:[%s3239_s5 + $0x28] sm:$0xff]  }
0x2537   :  { %v1079_v0 = vpack.c.bf16 %v2960_v63, %v2960_v63 }
0x2539   :  { %1081 = vrot.lane.b32.xlu1 %v1079_v0, %s2656_s16 }
0x25ab   :  { %v1082_v1 = vpop.permute.xlu1 %1081 }
0x25ac   :  { %2333 = vmatmul.mubr.msk.bf16.vlgmr.msra.gmra.mrb[24].mxu1 %vm93_vm1, %v1082_v1 }
0x25ad   :  { %2352 = vmatprep.mubr.msk.bf16.mxu1 %vm2658_vm0, %v2657_v12 }
0x267f   :  { %v1120_v3 = vpop.f32.mrb[24].mxu1 }
0x2680   :  { %v1121_v4 = vadd.f32 %v1120_v3, %v2762_v19  ;;  %v2334_v5 = vpop.f32.mrb[25].mxu1 }
0x2681   :  { %v1123_v6 = vpop.f32.mrb[26].mxu1  ;;  %v2467_v5 = vld [vmem:[%s3239_s5 + $0x40] sm:$0xff]  }
0x2682   :  { %2603 = vtanh.f32 %v1121_v4  ;;  %v2335_v7 = vpop.f32.mrb[27].mxu1  ;;  %v2048_v9 = vmul.f32 -1.442695, %v1121_v4 }
0x2683   :  { %v2468_v7 = vld [vmem:[%s3239_s5 + $0x60] sm:$0xff]  }
0x2684   :  { %2605 = vpow2.f32 %v2048_v9 }
0x268c   :  { %v2604_v8 = vpop.eup %2603 }
0x268d   :  { %1135 = vrot.lane.b32.xlu0 %v2604_v8, %s2655_s15 }
0x268e   :  { %v2606_v10 = vpop.eup %2605 }
0x268f   :  { %v1129_v15 = vadd.f32 1.0, %v2606_v10  ;;  %v2469_v10 = vld [vmem:[%s3239_s5 + $0x48] sm:$0xff]  }
0x2691   :  { %2607 = vrcp.f32 %v1129_v15  ;;  %v2470_v15 = vld [vmem:[%s3239_s5 + $0x68] sm:$0xff]  }
0x269b   :  { %v2608_v18 = vpop.eup %2607 }
0x269c   :  { %v1133_v23 = vmul.f32 %v2608_v18, %v1067_v59  ;;  %v2465_v59 = vld [vmem:[%s3239_s5 + $0x18] sm:$0xff]  }
0x26ff   :  { %v1136_v20 = vpop.permute.xlu0 %1135 }
0x2700   :  { %v1138_v21 = vmul.f32 %v2608_v18, %v1136_v20  ;;  %v2472_v20 = vld [vmem:[%s3239_s5 + $0x70] sm:$0xff]  }
0x2702   :  { %1140 = vrot.lane.b32.xlu1 %v1138_v21, %s2656_s16  ;;  %v2473_v21 = vld [vmem:[%s3239_s5 + $0x58] sm:$0xff]  }
0x2774   :  { %v1141_v24 = vpop.permute.xlu1 %1140 }
0x2775   :  { %v1143_v25 = vadd.f32 %v1141_v24, %v1133_v23  ;;  %v2474_v23 = vld [vmem:[%s3239_s5 + $0x78] sm:$0xff]   ;;  %v2475_v24 = vld [vmem:[%s3241_s7] sm:$0xff]  }
0x2777   :  { %2609 = vtanh.f32 %v1143_v25 }
0x2781   :  { %v2610_v26 = vpop.eup %2609 }
0x2782   :  { %1146 = vrot.lane.b32.xlu0 %v2610_v26, %s2655_s15  ;;  %v2476_v26 = vld [vmem:[%s3241_s7 + $0x20] sm:$0xff]  }
0x27f4   :  { %v1147_v27 = vpop.permute.xlu0 %1146 }
0x27f5   :  { %v2972_v28 = vmul.f32 %v2608_v18, %v1147_v27  ;;  %v2471_v18 = vld [vmem:[%s3239_s5 + $0x50] sm:$0xff]  }
0x27f7   :  { %v1155_v30 = vpack.c.bf16 %v2972_v28, %v2972_v28 }
0x27f9   :  { %1157 = vrot.lane.b32.xlu1 %v1155_v30, %s2656_s16  ;;  %v2478_v30 = vld [vmem:[%s3241_s7 + $0x28] sm:$0xff]  }
0x286b   :  { %v1158_v31 = vpop.permute.xlu1 %1157 }
0x286c   :  { %2341 = vmatmul.mubr.msk.bf16.vlgmr.msra.gmra.mrb[28].mxu0 %vm93_vm1, %v1158_v31  ;;  %v2479_v31 = vld [vmem:[%s3241_s7 + $0x10] sm:$0xff]  }
0x286d   :  { %2364 = vmatprep.mubr.msk.bf16.mxu0 %vm2658_vm0, %v2657_v12 }
0x293f   :  { %v1196_v32 = vpop.f32.mrb[28].mxu0 }
0x2940   :  { %v1197_v33 = vadd.f32 %v1196_v32, %v2762_v19  ;;  %v2342_v34 = vpop.f32.mrb[29].mxu0  ;;  %v2480_v32 = vld [vmem:[%s3241_s7 + $0x30] sm:$0xff]  }
0x2941   :  { %v1199_v35 = vpop.f32.mrb[30].mxu0  ;;  %v2482_v34 = vld [vmem:[%s3241_s7 + $0x38] sm:$0xff]  }
0x2942   :  { %2611 = vtanh.f32 %v1197_v33  ;;  %v2343_v36 = vpop.f32.mrb[31].mxu0  ;;  %v2050_v40 = vmul.f32 -1.442695, %v1197_v33  ;;  %v2481_v33 = vld [vmem:[%s3241_s7 + $0x18] sm:$0xff]  }
0x2944   :  { %2613 = vpow2.f32 %v2050_v40 }
0x294c   :  { %v2612_v38 = vpop.eup %2611 }
0x294d   :  { %1211 = vrot.lane.b32.xlu0 %v2612_v38, %s2655_s15  ;;  %v2483_v38 = vld [vmem:[%s3241_s7 + $0x40] sm:$0xff]  }
0x294e   :  { %v2614_v42 = vpop.eup %2613 }
0x294f   :  { %v1205_v43 = vadd.f32 1.0, %v2614_v42  ;;  %v2484_v42 = vld [vmem:[%s3241_s7 + $0x60] sm:$0xff]  }
0x2951   :  { %2615 = vrcp.f32 %v1205_v43 }
0x295b   :  { %v2983_v47 = vpop.eup %2615 }
0x295c   :  { %v1209_v16 = vmul.f32 %v2983_v47, %v1143_v25 }
0x29bf   :  { %v1212_v48 = vpop.permute.xlu0 %1211 }
0x29c0   :  { %v1214_v19 = vmul.f32 %v2983_v47, %v1212_v48  ;;  %v2487_v48 = vld [vmem:[%s3241_s7 + $0x50] sm:$0xff]  }
0x29c2   :  { %1216 = vrot.lane.b32.xlu1 %v1214_v19, %s2656_s16  ;;  %v2489_v19 = vld [vmem:[%s3241_s7 + $0x58] sm:$0xff]  }
0x29c6   :  { %72 = vrot.lane.b32.xlu1 %v71_v50, %s2656_s16  ;;  %v2490_v50 = vld [vmem:[%s3241_s7 + $0x78] sm:$0xff]  }
0x29ca   :  { %390 = vrot.lane.b32.xlu1 %v2816_v39, %s2656_s16 }
0x29ce   :  { %694 = vrot.lane.b32.xlu1 %v2880_v2, %s2655_s15 }
0x29d2   :  { %999 = vrot.lane.b32.xlu1 %v2944_v41, %s2655_s15 }
0x29d6   :  { %162 = vrot.lane.b32.xlu1 %v2768_v37, %s2656_s16  ;;  %v2459_v37 = vld [vmem:[%s3239_s5] sm:$0xff]  }
0x29d7   :  { %2345 = vmatpush3.bf16.msra.mxu1 %v2459_v37 }
0x29d8   :  { %2346 = vmatprep.subr.bf16.mxu1 %v2657_v12 }
0x29da   :  { %466 = vrot.lane.b32.xlu1 %v2832_v60, %s2656_s16  ;;  %v2460_v60 = vld [vmem:[%s3239_s5 + $0x20] sm:$0xff]  }
0x29db   :  { %2357 = vmatpush3.bf16.msra.mxu0 %v2460_v60  ;;  %2347 = vmatpush3.bf16.msra.mxu1 %v2461_v53 }
0x29dc   :  { %2358 = vmatprep.subr.bf16.mxu0 %v2657_v12  ;;  %2348 = vmatprep.subr.bf16.mxu1 %v2657_v12 }
0x29de   :  { %771 = vrot.lane.b32.xlu1 %v2896_v29, %s2655_s15 }
0x29df   :  { %2359 = vmatpush3.bf16.msra.mxu0 %v2462_v54  ;;  %2349 = vmatpush3.bf16.msra.mxu1 %v2463_v13 }
0x29e0   :  { %2360 = vmatprep.subr.bf16.mxu0 %v2657_v12  ;;  %2350 = vmatprep.subr.bf16.mxu1 %v2657_v12 }
0x29e2   :  { %1075 = vrot.lane.b32.xlu1 %v2960_v63, %s2655_s15 }
0x29e3   :  { %2361 = vmatpush3.bf16.msra.mxu0 %v2464_v56  ;;  %2351 = vmatpush3.bf16.msra.mxu1 %v2465_v59 }
0x29e4   :  { %2362 = vmatprep.subr.bf16.mxu0 %v2657_v12  ;;  %2368 = vmatprep.subr.bf16.mxu1 %v2657_v12 }
0x2a34   :  { %v1217_v39 = vpop.permute.xlu1 %1216 }
0x2a35   :  { %v1219_v11 = vadd.f32 %v1217_v39, %v1209_v16 }
0x2a37   :  { %2617 = vtanh.f32 %v1219_v11 }
0x2a38   :  { %v73_v2 = vpop.permute.xlu1 %72 }
0x2a39   :  { %76 = vst.msk [vmem:[#allocation2] sm:$0x1] %vm75_vm2, %v73_v2 }
0x2a3c   :  { %v391_v41 = vpop.permute.xlu1 %390 }
0x2a3d   :  { %393 = vst.msk [vmem:[#allocation2 + $0x2] sm:$0x1] %vm75_vm2, %v391_v41 }
0x2a40   :  { %v695_v29 = vpop.permute.xlu1 %694 }
0x2a41   :  { %v2618_v51 = vpop.eup %2617 }
0x2a42   :  { %1222 = vrot.lane.b32.xlu0 %v2618_v51, %s2655_s15 }
0x2a44   :  { %v1000_v55 = vpop.permute.xlu1 %999 }
0x2a46   :  { %238 = vrot.lane.b32.xlu0 %v2784_v57, %s2656_s16  ;;  %v2466_v57 = vld [vmem:[%s3239_s5 + $0x38] sm:$0xff]  }
0x2a47   :  { %2363 = vmatpush3.bf16.msra.mxu0 %v2466_v57 }
0x2a48   :  { %v163_v58 = vpop.permute.xlu1 %162  ;;  %2380 = vmatprep.subr.bf16.mxu0 %v2657_v12 }
0x2a49   :  { %165 = vst.msk [vmem:[#allocation3] sm:$0x1] %vm75_vm2, %v163_v58 }
0x2a4a   :  { %542 = vrot.lane.b32.xlu0 %v2848_v22, %s2656_s16 }
0x2a4c   :  { %v467_v61 = vpop.permute.xlu1 %466 }
0x2a4d   :  { %469 = vst.msk [vmem:[#allocation3 + $0x2] sm:$0x1] %vm75_vm2, %v467_v61 }
0x2a4e   :  { %847 = vrot.lane.b32.xlu0 %v2912_v52, %s2655_s15 }
0x2a52   :  { %1151 = vrot.lane.b32.xlu0 %v2972_v28, %s2655_s15  ;;  %v2477_v28 = vld [vmem:[%s3241_s7 + $0x8] sm:$0xff]  }
0x2a56   :  { %314 = vrot.lane.b32.xlu0 %v2800_v17, %s2656_s16 }
0x2a5a   :  { %618 = vrot.lane.b32.xlu0 %v2864_v44, %s2656_s16  ;;  %v772_v44 = vpop.permute.xlu1 %771 }
0x2a5e   :  { %923 = vrot.lane.b32.xlu0 %v2928_v14, %s2655_s15  ;;  %v1076_v1 = vpop.permute.xlu1 %1075 }
0x2ab4   :  { %v1223_v22 = vpop.permute.xlu0 %1222 }
0x2ab5   :  { %v1225_v62 = vmul.f32 %v2983_v47, %v1223_v22  ;;  %v2486_v47 = vld [vmem:[%s3241_s7 + $0x68] sm:$0xff]  }
0x2ab7   :  { %1227 = vrot.lane.b32.xlu0 %v1225_v62, %s2655_s15 }
0x2ab8   :  { %v239_v52 = vpop.permute.xlu0 %238 }
0x2ab9   :  { %241 = vst.msk [vmem:[#allocation2 + $0x1] sm:$0x1] %vm75_vm2, %v239_v52  ;;  %v1558_v52 = vld [vmem:[%s3240_s6] sm:$0xf] }
0x2aba   :  { %1002 = vst.msk [vmem:[#allocation2 + $0x1] sm:$0x1] %vm697_vm3, %v1000_v55 }
0x2abc   :  { %v543_v63 = vpop.permute.xlu0 %542 }
0x2abd   :  { %545 = vst.msk [vmem:[#allocation2 + $0x3] sm:$0x1] %vm75_vm2, %v543_v63 }
0x2abe   :  { %698 = vst.msk [vmem:[#allocation2 + $0x3] sm:$0x1] %vm697_vm3, %v695_v29 }
0x2ac0   :  { %v848_v17 = vpop.permute.xlu0 %847 }
0x2ac1   :  { %850 = vst.msk [vmem:[#allocation2 + $0x2] sm:$0x1] %vm697_vm3, %v848_v17 }
0x2ac4   :  { %v1152_v14 = vpop.permute.xlu0 %1151 }
0x2ac5   :  { %1154 = vst.msk [vmem:[#allocation2] sm:$0x1] %vm697_vm3, %v1152_v14 }
0x2ac8   :  { %v315_v0 = vpop.permute.xlu0 %314 }
0x2ac9   :  { %317 = vst.msk [vmem:[#allocation3 + $0x1] sm:$0x1] %vm75_vm2, %v315_v0 }
0x2aca   :  { %1078 = vst.msk [vmem:[#allocation3 + $0x1] sm:$0x1] %vm697_vm3, %v1076_v1  ;;  %v2659_v1 = vmov 0  }
0x2acb   :  { %2456 = vset.pattern.permute.xlu1 %v2659_v1  ;;  %2455 = vset.pattern.permute.xlu0 %v2659_v1 }
0x2acc   :  { %v619_v3 = vpop.permute.xlu0 %618  ;;  %v1232_v4 = vld [vmem:[#allocation2] sm:$0xf] }
0x2acd   :  { %621 = vst.msk [vmem:[#allocation3 + $0x3] sm:$0x1] %vm75_vm2, %v619_v3  ;;  %v1233_v6 = vpack.c.bf16 %v1232_v4, %v1232_v4 }
0x2ace   :  { %774 = vst.msk [vmem:[#allocation3 + $0x3] sm:$0x1] %vm697_vm3, %v772_v44 }
0x2acf   :  { %2353 = vmatmul.mubr.msk.bf16.vlgmr.msra.gmra.mrb[28].mxu1 %vm1266_vm4, %v1233_v6  ;;  %v1319_v8 = vshrl.u32 %v1233_v6, 16  ;;  %v1398_v25 = vrot.slane %v1233_v6, 1 }
0x2ad0   :  { %2369 = vmatpush3.bf16.msra.mxu1 %v2467_v5  ;;  %v924_v9 = vpop.permute.xlu0 %923  ;;  %2376 = vmatprep.mubr.msk.bf16.mxu1 %vm2658_vm0, %v2657_v12 }
0x2ad1   :  { %926 = vst.msk [vmem:[#allocation3 + $0x2] sm:$0x1] %vm697_vm3, %v924_v9  ;;  %2365 = vmatmul.mubr.msk.bf16.vlgmr.msra.gmra.mrb[32].mxu0 %vm1266_vm4, %v1319_v8  ;;  %2370 = vmatprep.subr.bf16.mxu1 %v2657_v12  ;;  %v1475_v27 = vrot.slane %v1319_v8, 1 }
0x2ad2   :  { %2381 = vmatpush3.bf16.msra.mxu0 %v2468_v7  ;;  %2388 = vmatprep.mubr.msk.bf16.mxu0 %vm2658_vm0, %v2657_v12 }
0x2ad3   :  { %2382 = vmatprep.subr.bf16.mxu0 %v2657_v12 }
0x2ad4   :  { %2371 = vmatpush3.bf16.msra.mxu1 %v2469_v10 }
0x2ad5   :  { %2372 = vmatprep.subr.bf16.mxu1 %v2657_v12 }
0x2ad6   :  { %2383 = vmatpush3.bf16.msra.mxu0 %v2470_v15 }
0x2ad7   :  { %2384 = vmatprep.subr.bf16.mxu0 %v2657_v12 }
0x2ad8   :  { %2373 = vmatpush3.bf16.msra.mxu1 %v2471_v18 }
0x2ad9   :  { %2374 = vmatprep.subr.bf16.mxu1 %v2657_v12 }
0x2ada   :  { %2385 = vmatpush3.bf16.msra.mxu0 %v2472_v20 }
0x2adb   :  { %2386 = vmatprep.subr.bf16.mxu0 %v2657_v12 }
0x2adc   :  { %2375 = vmatpush3.bf16.msra.mxu1 %v2473_v21 }
0x2add   :  { %2392 = vmatprep.subr.bf16.mxu1 %v2657_v12 }
0x2ade   :  { %2387 = vmatpush3.bf16.msra.mxu0 %v2474_v23 }
0x2adf   :  { %2377 = vmatmul.mubr.msk.bf16.vlgmr.msra.gmra.mrb[32].mxu1 %vm1266_vm4, %v1398_v25  ;;  %2404 = vmatprep.subr.bf16.mxu0 %v2657_v12 }
0x2ae0   :  { %2393 = vmatpush3.bf16.msra.mxu1 %v2475_v24  ;;  %2400 = vmatprep.mubr.msk.bf16.mxu1 %vm2658_vm0, %v2657_v12 }
0x2ae1   :  { %2389 = vmatmul.mubr.msk.bf16.vlgmr.msra.gmra.mrb[36].mxu0 %vm1266_vm4, %v1475_v27  ;;  %2394 = vmatprep.subr.bf16.mxu1 %v2657_v12 }
0x2ae2   :  { %2405 = vmatpush3.bf16.msra.mxu0 %v2476_v26  ;;  %2412 = vmatprep.mubr.msk.bf16.mxu0 %vm2658_vm0, %v2657_v12 }
0x2ae3   :  { %2406 = vmatprep.subr.bf16.mxu0 %v2657_v12 }
0x2ae4   :  { %2395 = vmatpush3.bf16.msra.mxu1 %v2477_v28 }
0x2ae5   :  { %2396 = vmatprep.subr.bf16.mxu1 %v2657_v12 }
0x2ae6   :  { %2407 = vmatpush3.bf16.msra.mxu0 %v2478_v30 }
0x2ae7   :  { %2408 = vmatprep.subr.bf16.mxu0 %v2657_v12 }
0x2ae8   :  { %2397 = vmatpush3.bf16.msra.mxu1 %v2479_v31  ;;  %v1934_v31 = vld [vmem:[%s3242_s8] sm:$0xf] }
0x2ae9   :  { %2398 = vmatprep.subr.bf16.mxu1 %v2657_v12 }
0x2aea   :  { %2409 = vmatpush3.bf16.msra.mxu0 %v2480_v32 }
0x2aeb   :  { %2410 = vmatprep.subr.bf16.mxu0 %v2657_v12 }
0x2aec   :  { %2399 = vmatpush3.bf16.msra.mxu1 %v2481_v33 }
0x2aed   :  { %2416 = vmatprep.subr.bf16.mxu1 %v2657_v12 }
0x2aee   :  { %2411 = vmatpush3.bf16.msra.mxu0 %v2482_v34 }
0x2aef   :  { %2428 = vmatprep.subr.bf16.mxu0 %v2657_v12 }
0x2b29   :  { %v1228_v35 = vpop.permute.xlu0 %1227 }
0x2b2a   :  { %1230 = vst.msk [vmem:[#allocation3] sm:$0x1] %vm697_vm3, %v1228_v35 }
0x2b31   :  { %v1612_v36 = vld [vmem:[#allocation3] sm:$0xf] }
0x2b32   :  { %v1613_v40 = vpack.c.bf16 %v1612_v36, %v1612_v36 }
0x2b34   :  { %2401 = vmatmul.mubr.msk.bf16.vlgmr.msra.gmra.mrb[36].mxu1 %vm1266_vm4, %v1613_v40  ;;  %v1698_v43 = vshrl.u32 %v1613_v40, 16  ;;  %v1777_v16 = vrot.slane %v1613_v40, 1 }
0x2b35   :  { %2417 = vmatpush3.bf16.msra.mxu1 %v2483_v38  ;;  %2424 = vmatprep.mubr.msk.bf16.mxu1 %vm2658_vm0, %v2657_v12 }
0x2b36   :  { %2413 = vmatmul.mubr.msk.bf16.vlgmr.msra.gmra.mrb[40].mxu0 %vm1266_vm4, %v1698_v43  ;;  %2418 = vmatprep.subr.bf16.mxu1 %v2657_v12  ;;  %v1854_v39 = vrot.slane %v1698_v43, 1 }
0x2b37   :  { %2429 = vmatpush3.bf16.msra.mxu0 %v2484_v42  ;;  %2436 = vmatprep.mubr.msk.bf16.mxu0 %vm2658_vm0, %v2657_v12 }
0x2b38   :  { %2430 = vmatprep.subr.bf16.mxu0 %v2657_v12 }
0x2b39   :  { %2419 = vmatpush3.bf16.msra.mxu1 %v2485_v46 }
0x2b3a   :  { %2420 = vmatprep.subr.bf16.mxu1 %v2657_v12 }
0x2b3b   :  { %2431 = vmatpush3.bf16.msra.mxu0 %v2486_v47  ;;  %v1231_v47 = vld [vmem:[%s3234_s0] sm:$0xf] }
0x2b3c   :  { %2432 = vmatprep.subr.bf16.mxu0 %v2657_v12  ;;  %vm1964_vm13 = vcmp.eq.s32.totalorder %v1231_v47, 1 }
0x2b3d   :  { %2421 = vmatpush3.bf16.msra.mxu1 %v2487_v48 }
0x2b3e   :  { %2422 = vmatprep.subr.bf16.mxu1 %v2657_v12 }
0x2b3f   :  { %2433 = vmatpush3.bf16.msra.mxu0 %v2488_v49 }
0x2b40   :  { %2434 = vmatprep.subr.bf16.mxu0 %v2657_v12 }
0x2b41   :  { %2423 = vmatpush3.bf16.msra.mxu1 %v2489_v19 }
0x2b43   :  { %2435 = vmatpush3.bf16.msra.mxu0 %v2490_v50 }
0x2b44   :  { %2425 = vmatmul.mubr.msk.bf16.vlgmr.msra.gmra.mrb[40].mxu1 %vm1266_vm4, %v1777_v16 }
0x2b46   :  { %2437 = vmatmul.mubr.msk.bf16.vlgmr.msra.gmra.mrb[44].mxu0 %vm1266_vm4, %v1854_v39  ;;  %v1611_v39 = vld [vmem:[%s3235_s1] sm:$0xf] }
0x2ba2   :  { %v1304_v11 = vpop.f32.mrb[28].mxu1 }
0x2ba3   :  { %v2354_v2 = vpop.f32.mrb[29].mxu1 }
0x2ba4   :  { %v1307_v41 = vpop.f32.mrb[30].mxu1  ;;  %v1382_v37 = vpop.f32.mrb[32].mxu0 }
0x2ba5   :  { %v1544_v60 = vrot.slane %v1382_v37, 7  ;;  %v2355_v29 = vpop.f32.mrb[31].mxu1  ;;  %v2366_v51 = vpop.f32.mrb[33].mxu0 }
0x2ba6   :  { %v1385_v53 = vpop.f32.mrb[34].mxu0 }
0x2ba7   :  { %v1553_v54 = vsel %vm1552_vm5, %v1304_v11, %v1544_v60  ;;  %v2367_v12 = vpop.f32.mrb[35].mxu0 }
0x2bb2   :  { %v1460_v55 = vpop.f32.mrb[32].mxu1 }
0x2bb3   :  { %v1547_v13 = vrot.slane %v1460_v55, 6  ;;  %v2378_v56 = vpop.f32.mrb[33].mxu1 }
0x2bb4   :  { %v1463_v58 = vpop.f32.mrb[34].mxu1  ;;  %v1537_v59 = vpop.f32.mrb[36].mxu0 }
0x2bb5   :  { %v1555_v57 = vsel %vm1554_vm6, %v1553_v54, %v1547_v13  ;;  %v1550_v61 = vrot.slane %v1537_v59, 5  ;;  %v2379_v22 = vpop.f32.mrb[35].mxu1  ;;  %v2390_v62 = vpop.f32.mrb[37].mxu0  ;;  %v1581_v13 = vand.u32 127, %v68_v45 }
0x2bb6   :  { %v1540_v63 = vpop.f32.mrb[38].mxu0 }
0x2bb7   :  { %v2391_v17 = vpop.f32.mrb[39].mxu0  ;;  %v1557_v44 = vsel %vm1556_vm7, %v1555_v57, %v1550_v61 }
0x2bb8   :  { %v1559_v14 = vadd.f32 %v1558_v52, %v1557_v44 }
0x2bba   :  { %v1561_v0 = vsel %vm1560_vm8, %v1559_v14, -inf }
0x2bbb   :  { %1562 = vmax.xlane.f32.xlu0 %v1561_v0 }
0x2c07   :  { %v1683_v3 = vpop.f32.mrb[36].mxu1 }
0x2c08   :  { %v2402_v4 = vpop.f32.mrb[37].mxu1 }
0x2c09   :  { %v1686_v5 = vpop.f32.mrb[38].mxu1  ;;  %v1761_v6 = vpop.f32.mrb[40].mxu0 }
0x2c0a   :  { %v1923_v7 = vrot.slane %v1761_v6, 7  ;;  %v2403_v8 = vpop.f32.mrb[39].mxu1  ;;  %v2414_v9 = vpop.f32.mrb[41].mxu0 }
0x2c0b   :  { %v1764_v10 = vpop.f32.mrb[42].mxu0 }
0x2c0c   :  { %v1931_v15 = vsel %vm1552_vm5, %v1683_v3, %v1923_v7  ;;  %v2415_v18 = vpop.f32.mrb[43].mxu0 }
0x2c17   :  { %v1839_v20 = vpop.f32.mrb[40].mxu1 }
0x2c18   :  { %v1926_v21 = vrot.slane %v1839_v20, 6  ;;  %v2426_v23 = vpop.f32.mrb[41].mxu1 }
0x2c19   :  { %v1842_v24 = vpop.f32.mrb[42].mxu1  ;;  %v1916_v25 = vpop.f32.mrb[44].mxu0 }
0x2c1a   :  { %v1932_v26 = vsel %vm1554_vm6, %v1931_v15, %v1926_v21  ;;  %v1929_v27 = vrot.slane %v1916_v25, 5  ;;  %v2427_v28 = vpop.f32.mrb[43].mxu1  ;;  %v2438_v30 = vpop.f32.mrb[45].mxu0 }
0x2c1b   :  { %v1919_v32 = vpop.f32.mrb[46].mxu0 }
0x2c1c   :  { %v2439_v33 = vpop.f32.mrb[47].mxu0  ;;  %v1933_v34 = vsel %vm1556_vm7, %v1932_v26, %v1929_v27 }
0x2c1d   :  { %v1935_v35 = vadd.f32 %v1934_v31, %v1933_v34 }
0x2c1f   :  { %v1937_v36 = vsel %vm1936_vm9, %v1935_v35, -inf }
0x2c20   :  { %1938 = vmax.xlane.f32.xlu1 %v1937_v36 }
0x2c48   :  { %v1563_v38 = vpop.xlane.xlu0 %1562 }
0x2c49   :  { %v1564_v40 = vsub.f32 %v1559_v14, %v1563_v38 }
0x2c4b   :  { %v1565_v42 = vmul.f32 1.442695, %v1564_v40 }
0x2c4d   :  { %2619 = vpow2.f32 %v1565_v42 }
0x2c57   :  { %v2620_v43 = vpop.eup %2619 }
0x2c58   :  { %v1567_v46 = vsel %vm1560_vm8, %v2620_v43, 0.0 }
0x2c59   :  { %1568 = vadd.xlane.f32.xlu1 %v1567_v46 }
0x2c6a   :  { %1583 = vperm.xlu1 %2456, %v1231_v47  }
0x2cad   :  { %v1939_v48 = vpop.xlane.xlu1 %1938 }
0x2cae   :  { %v1940_v49 = vsub.f32 %v1935_v35, %v1939_v48 }
0x2cb0   :  { %v1941_v19 = vmul.f32 1.442695, %v1940_v49 }
0x2cb2   :  { %2621 = vpow2.f32 %v1941_v19 }
0x2cbc   :  { %v2622_v50 = vpop.eup %2621 }
0x2cbd   :  { %v1943_v16 = vsel %vm1936_vm9, %v2622_v50, 0.0 }
0x2cbe   :  { %1944 = vadd.xlane.f32.xlu0 %v1943_v16 }
0x2cd4   :  { %1957 = vperm.xlu0 %2455, %v1611_v39  }
0x2ce6   :  { %v1569_v11 = vpop.xlane.xlu1 %1568 }
0x2ce7   :  { %2623 = vrcp.f32 %v1569_v11 }
0x2ce8   :  { %2625 = vlog2.f32 %v1569_v11 }
0x2cea   :  { %v1584_v61 = vpop.permute.xlu1 %1583 }
0x2ceb   :  { %vm1585_vm11 = vcmp.eq.s32.totalorder %v1581_v13, %v1584_v61 }
0x2cf1   :  { %v2624_v2 = vpop.eup %2623 }
0x2cf2   :  { %v2626_v41 = vpop.eup %2625  ;;  %v1571_v60 = vmul.f32 %v2624_v2, %v2620_v43 }
0x2cf3   :  { %v1573_v37 = vmul.f32 0.6931472, %v2626_v41 }
0x2cf5   :  { %v1574_v29 = vsub.f32 %v1564_v40, %v1573_v37 }
0x2cf7   :  { %v1575_v51 = vmul.f32 %v1574_v29, %v1571_v60  ;;  %v1586_v17 = vsel %vm1585_vm11, %v1574_v29, 0.0 }
0x2cf8   :  { %v1587_v44 = vsel %vm1560_vm8, %v1586_v17, 0.0 }
0x2cf9   :  { %v1576_v53 = vsel %vm1560_vm8, %v1575_v51, 0.0 }
0x2cfa   :  { %1577 = vadd.xlane.f32.xlu0 %v1576_v53 }
0x2d4b   :  { %v1945_v54 = vpop.xlane.xlu0 %1944 }
0x2d4c   :  { %2627 = vlog2.f32 %v1945_v54 }
0x2d4d   :  { %2629 = vrcp.f32 %v1945_v54 }
0x2d53   :  { %v1958_v12 = vpop.permute.xlu0 %1957 }
0x2d54   :  { %vm1959_vm10 = vcmp.eq.s32.totalorder %v1581_v13, %v1958_v12 }
0x2d56   :  { %v2628_v55 = vpop.eup %2627 }
0x2d57   :  { %v2630_v56 = vpop.eup %2629  ;;  %v1949_v58 = vmul.f32 0.6931472, %v2628_v55 }
0x2d58   :  { %v1947_v57 = vmul.f32 %v2630_v56, %v2622_v50 }
0x2d59   :  { %v1950_v59 = vsub.f32 %v1940_v49, %v1949_v58 }
0x2d5b   :  { %v1960_v22 = vsel %vm1959_vm10, %v1950_v59, 0.0  ;;  %v1951_v52 = vmul.f32 %v1950_v59, %v1947_v57 }
0x2d5c   :  { %v1961_v62 = vsel %vm1936_vm9, %v1960_v22, 0.0 }
0x2d5d   :  { %1962 = vadd.xlane.f32.xlu1 %v1961_v62  ;;  %v1952_v63 = vsel %vm1936_vm9, %v1951_v52, 0.0 }
0x2d61   :  { %1953 = vadd.xlane.f32.xlu1 %v1952_v63 }
0x2d65   :  { %1588 = vadd.xlane.f32.xlu1 %v1587_v44 }
0x2d87   :  { %v1578_v45 = vpop.xlane.xlu0 %1577 }
0x2d88   :  { %v1579_v14 = vsub.f32 0.0, %v1578_v45 }
0x2d8a   :  { %v1591_v0 = vsel %vm1590_vm12, %v1579_v14, 0.0 }
0x2d8b   :  { %1592 = vadd.xlane.f32.xlu1 %v1591_v0 }
0x2dea   :  { %v1963_v1 = vpop.xlane.xlu1 %1962 }
0x2deb   :  { %v1977_v9 = vsel %vm1964_vm13, %v1963_v1, 0.0 }
0x2dec   :  { %v1978_v10 = vsel %vm1590_vm12, %v1977_v9, 0.0 }
0x2dee   :  { %v1954_v3 = vpop.xlane.xlu1 %1953 }
0x2def   :  { %v1955_v4 = vsub.f32 0.0, %v1954_v3 }
0x2df1   :  { %v1965_v7 = vsel %vm1964_vm13, %v1955_v4, 0.0 }
0x2df2   :  { %v1589_v5 = vpop.xlane.xlu1 %1588  ;;  %v1966_v8 = vsel %vm1590_vm12, %v1965_v7, 0.0 }
0x2df3   :  { %v1601_v6 = vsel %vm1590_vm12, %v1589_v5, 0.0 }
0x2df4   :  { %1602 = vadd.xlane.f32.xlu1 %v1601_v6 }
0x2df8   :  { %1967 = vadd.xlane.f32.xlu1 %v1966_v8 }
0x2dfc   :  { %1979 = vadd.xlane.f32.xlu1 %v1978_v10 }
0x2e18   :  { %v1593_v15 = vpop.xlane.xlu1 %1592 }
0x2e19   :  { %v1594_v18 = vrot.slane %v1593_v15, 4 }
0x2e1b   :  { %v1595_v20 = vadd.f32 %v1594_v18, %v1593_v15 }
0x2e1d   :  { %v1596_v21 = vrot.slane %v1595_v20, 2 }
0x2e1f   :  { %v1597_v23 = vadd.f32 %v1596_v21, %v1595_v20 }
0x2e21   :  { %v1598_v24 = vrot.slane %v1597_v23, 1 }
0x2e23   :  { %v1599_v25 = vadd.f32 %v1598_v24, %v1597_v23 }
0x2e25   :  { %2440 = vpush %v1599_v25 }
0x2e56   :  { %s2441_s0 = spop %2440 }
0x2e81   :  { %v1603_v26 = vpop.xlane.xlu1 %1602 }
0x2e82   :  { %v1604_v27 = vrot.slane %v1603_v26, 4 }
0x2e84   :  { %v1605_v28 = vadd.f32 %v1604_v27, %v1603_v26 }
0x2e85   :  { %v1968_v30 = vpop.xlane.xlu1 %1967 }
0x2e86   :  { %v1606_v31 = vrot.slane %v1605_v28, 2  ;;  %v1969_v32 = vrot.slane %v1968_v30, 4 }
0x2e88   :  { %v1970_v33 = vadd.f32 %v1969_v32, %v1968_v30  ;;  %v1607_v34 = vadd.f32 %v1606_v31, %v1605_v28 }
0x2e89   :  { %v1980_v35 = vpop.xlane.xlu1 %1979 }
0x2e8a   :  { %v1971_v36 = vrot.slane %v1970_v33, 2  ;;  %v1981_v38 = vrot.slane %v1980_v35, 4  ;;  %v1608_v40 = vrot.slane %v1607_v34, 1 }
0x2e8c   :  { %v1982_v42 = vadd.f32 %v1981_v38, %v1980_v35  ;;  %v1609_v43 = vadd.f32 %v1608_v40, %v1607_v34  ;;  %v1972_v46 = vadd.f32 %v1971_v36, %v1970_v33 }
0x2e8e   :  { %v1983_v47 = vrot.slane %v1982_v42, 2  ;;  %2442 = vpush %v1609_v43  ;;  %v1973_v48 = vrot.slane %v1972_v46, 1 }
0x2e90   :  { %v1984_v49 = vadd.f32 %v1983_v47, %v1982_v42  ;;  %v1974_v19 = vadd.f32 %v1973_v48, %v1972_v46 }
0x2e92   :  { %2444 = vpush %v1974_v19  ;;  %v1985_v50 = vrot.slane %v1984_v49, 1 }
0x2e94   :  { %v1986_v16 = vadd.f32 %v1985_v50, %v1984_v49 }
0x2e96   :  { %2446 = vpush %v1986_v16 }
0x2ebf   :  { %s2443_s1 = spop %2442 }
0x2ec3   :  { %s2445_s3 = spop %2444 }
0x2ec4   :  { %s1976_s20 = sadd.f32 %s2445_s3, %s2441_s0 }
0x2ec6   :  { %1990 = sst [smem:[#allocation4]] %s1976_s20 }
0x2ec7   :  { %s2447_s4 = spop %2446 }
0x2ec8   :  { %s1988_s21 = sadd.f32 %s2447_s4, %s2443_s1 }
0x2ec9   :  { %2640 = shalt.err (!%p2637_p2)
}
0x2eca   :  { %s2660_s29 = smov [#allocation4]   ;;  %1992 = sst [smem:[#allocation6]] %s1988_s21 }
0x2ecb   :  { %2000 = dma.smem_to_hbm %s2660_s29, 16, %s3243_s9, [#allocation5]  }
0x2ecc   :  { %s2641_s13 = scalar_lea.hbm %s3244_s10, 16 }
0x2ecd   :  { %p2642_p3 = scmp.ne.s32.totalorder %s3244_s10, %s2641_s13  ;;  %p2645_p4 = scmp.lt.u32.totalorder %s2641_s13, %s3244_s10 }
0x2ecf   :  { %p2647_p5 = pnand %p2645_p4, %p2642_p3 }
0x2ed1   :  { %2650 = shalt.err (!%p2647_p5)
}
0x2ed2   :  { %s2661_s6 = smov [#allocation6]  }
0x2ed3   :  { %2008 = dma.smem_to_hbm %s2661_s6, 16, %s3244_s10, [#allocation7]  }
0x2ed4   :  { %2651 = dma.done.wait [#allocation5], 16  }
0x2ed5   :  { %2652 = vsyncadd [#allocation5], 4294967280 }
0x2ed6   :  { %2653 = dma.done.wait [#allocation7], 16  }
0x2ed7   :  { %2654 = vsyncadd [#allocation7], 4294967280 }
0x2ed8   :  { %2015 = sfence }
0x2ed9   :  { %2016 = vsyncpa [#allocation5], 1 }
0x2eda   :  { %2017 = vsyncpa [#allocation7], 1 }

</bundles_post_ra>
